<compile_context>
chip_gen: v7x
topology: tpu7x:2x2x1
jax: 0.10.0
libtpu: 0.0.40
codegen_flags: <defaults>
</compile_context>

<pallas_src>
import functools
import math

import jax
import jax.numpy as jnp
from jax import lax
from jax.experimental import pallas as pl
from jax.experimental.pallas import tpu as pltpu


def _round_up(n, m):
    return ((n + m - 1) // m) * m


def _leaky(x, slope):
    # LeakyReLU for 0 < slope < 1: max(x, slope*x)  (mul + max, no select).
    return jnp.maximum(x, slope * x)


# ----------------------------------------------------------------------------
# The fused DenseBlock kernel (one grid step = `bt` batch samples)
# ----------------------------------------------------------------------------
def dense_block_kernel(x_ref, m_ref, w_ref, v_ref, o_ref, *,
                       W, hw, bt, cin, gc, cout, wseg, vseg, slope, mxu_dtype):
    masks = m_ref[...]                                   # (9, L) f32
    L = bt * hw

    def im2col(xf):
        """xf: (C, L) f32 -> (9*C, L) tap matrix, tap-major K layout."""
        pieces = []
        t = 0
        for oy in (-1, 0, 1):
            for ox in (-1, 0, 1):
                off = oy * W + ox
                if off == 0:
                    pieces.append(xf)                    # centre tap, always valid
                else:
                    # tap[p] = xf[p + off]; wrap positions (image borders and
                    # sample boundaries) are killed by the per-tap mask.
                    tap = pltpu.roll(xf, shift=(-off) % L, axis=1)  # XLU rotate
                    pieces.append(tap * masks[t:t + 1, :])
                t += 1
        return jnp.concatenate(pieces, axis=0)

    def unet_block(xf, Ci, Co, w_off, v_off, outer_slope):
        w1_off, w2_off = w_off
        b1c_off, b2_off, nw_off, nb_off, inv_off = v_off

        # Static slices of the packed parameter slabs (sublane-aligned starts).
        w1c = w_ref[w1_off:w1_off + 2 * Co, 0:9 * Ci]    # [conv_1 ; identity@centre]
        w2f = w_ref[w2_off:w2_off + Co, 0:9 * Co]
        b1c = v_ref[b1c_off:b1c_off + 2 * Co, :]         # [b1 ; b_identity]
        b2 = v_ref[b2_off:b2_off + Co, :]
        nw_h = v_ref[nw_off:nw_off + Co, :]              # [IN weight ; 0]
        nb_h = v_ref[nb_off:nb_off + Co, :]              # [IN bias   ; 0]
        inv_h = v_ref[inv_off:inv_off + Co, :]           # [0 ; 1]  pass-through half

        # --- conv_1 (3x3) + identity 1x1, one wide-K MXU pass ---------------
        t1 = im2col(xf).astype(mxu_dtype)
        y = jnp.dot(w1c, t1, preferred_element_type=jnp.float32) + b1c
        conv1 = y[:Co, :]                                # (Co, L)
        idn = y[Co:2 * Co, :]                            # (Co, L)

        # --- Half Instance Norm, folded into one per-channel affine ---------
        # Statistics are per sample (instance norm), so loop over the bt
        # lane segments (static unroll; slices are 128-lane aligned).
        segs = []
        for b in range(bt):
            c = conv1[:, b * hw:(b + 1) * hw]
            mean = jnp.mean(c, axis=1, keepdims=True)
            var = jnp.mean(c * c, axis=1, keepdims=True) - mean * mean
            gsc = nw_h * lax.rsqrt(var + 1e-5)           # 0 on the pass-through half
            g = gsc + inv_h
            beta = nb_h - mean * gsc
            segs.append(c * g + beta)
        hin = segs[0] if bt == 1 else jnp.concatenate(segs, axis=1)
        act = _leaky(hin, 0.1)                           # relu_1

        # --- conv_2 (3x3) + relu_2 + identity add + outer LeakyReLU ---------
        t2 = im2col(act).astype(mxu_dtype)
        out = jnp.dot(w2f, t2, preferred_element_type=jnp.float32) + b2
        out = _leaky(out, 0.1) + idn
        return _leaky(out, outer_slope)

    xf = x_ref[0].astype(jnp.float32)                    # (cin, L)
    x1 = unet_block(xf, cin, gc, wseg[0], vseg[0], slope)
    x2 = unet_block(x1, gc, cout, wseg[1], vseg[1], slope)
    o_ref[0] = x2.astype(o_ref.dtype)


# ----------------------------------------------------------------------------
# Parameter packing: one weight slab + one (rows, 1) vector slab
# ----------------------------------------------------------------------------
def _pack_params(p1, p2, cin, gc, cout, mxu_dtype):
    def block(p, Ci, Co):
        # conv_1: (3,3,Ci,Co) -> (Co, 9*Ci), K index = (dy*3+dx)*Ci + ci.
        w1f = jnp.transpose(p["w1"], (3, 0, 1, 2)).reshape(Co, 9 * Ci)
        # identity 1x1 conv reads the centre tap (tap index 4).
        wid = jnp.zeros((Co, 9 * Ci), jnp.float32)
        wid = wid.at[:, 4 * Ci:5 * Ci].set(jnp.transpose(p["wid"]))
        w1c = jnp.concatenate([w1f, wid], axis=0)                  # (2Co, 9Ci)
        w2f = jnp.transpose(p["w2"], (3, 0, 1, 2)).reshape(Co, 9 * Co)
        half = Co // 2
        b1c = jnp.concatenate([p["b1"].reshape(Co, 1),
                               p["bid"].reshape(Co, 1)], axis=0)   # (2Co, 1)
        b2 = p["b2"].reshape(Co, 1)
        z = jnp.zeros((Co - half, 1), jnp.float32)
        nw_h = jnp.concatenate([p["nw"].reshape(half, 1), z], axis=0)
        nb_h = jnp.concatenate([p["nb"].reshape(half, 1), z], axis=0)
        inv_h = jnp.concatenate([jnp.zeros((half, 1), jnp.float32),
                                 jnp.ones((Co - half, 1), jnp.float32)], axis=0)
        return (w1c, w2f), (b1c, b2, nw_h, nb_h, inv_h)

    mats_a, vecs_a = block(p1, cin, gc)
    mats_b, vecs_b = block(p2, gc, cout)

    # Weight slab: segments stacked on rows (16-row-aligned starts), K padded
    # to the max K; each matmul slices only the rows/cols it actually needs.
    mats = mats_a + mats_b
    kmax = max(m.shape[1] for m in mats)
    w_offs, r = [], 0
    for m in mats:
        r = _round_up(r, 16)
        w_offs.append(r)
        r += m.shape[0]
    wslab = jnp.zeros((_round_up(r, 16), kmax), jnp.float32)
    for off, m in zip(w_offs, mats):
        wslab = wslab.at[off:off + m.shape[0], :m.shape[1]].set(m)
    wslab = wslab.astype(mxu_dtype)

    # Vector slab: all biases / HIN affine vectors, 8-row-aligned, f32.
    vecs = vecs_a + vecs_b
    v_offs, r = [], 0
    for v in vecs:
        r = _round_up(r, 8)
        v_offs.append(r)
        r += v.shape[0]
    vslab = jnp.zeros((_round_up(r, 8), 1), jnp.float32)
    for off, v in zip(v_offs, vecs):
        vslab = vslab.at[off:off + v.shape[0], :].set(v)

    wseg = (tuple(w_offs[:2]), tuple(w_offs[2:]))
    vseg = (tuple(v_offs[:5]), tuple(v_offs[5:]))
    return wslab, vslab, wseg, vseg


# ----------------------------------------------------------------------------
# Wrapper
# ----------------------------------------------------------------------------
@functools.partial(jax.jit, static_argnames=("bt", "use_bf16_mxu"))
def dense_block_forward(x_nchw, p1, p2, *, bt=None, use_bf16_mxu=False):
    N, cin, H, W = x_nchw.shape
    HW = H * W
    gc = p1["w1"].shape[-1]
    cout = p2["w1"].shape[-1]

    # Samples per grid step: widen the matmul lane dim while keeping >= 2
    # grid steps so v7x's two TensorCores both get work.
    if bt is None:
        bt = max(1, N // 2)
    G = -(-N // bt)
    n_pad = G * bt
    L = bt * HW

    xf = x_nchw.reshape(N, cin, HW).astype(jnp.float32)
    if n_pad != N:
        xf = jnp.concatenate(
            [xf, jnp.zeros((n_pad - N, cin, HW), jnp.float32)], axis=0)
    # (G, bt, C, HW) -> (G, C, bt*HW): lane axis = bt samples side by side.
    xg = xf.reshape(G, bt, cin, HW).transpose(0, 2, 1, 3).reshape(G, cin, L)

    # Per-tap validity masks (row + column halos), replicated per sample.
    pos = jnp.arange(L, dtype=jnp.int32)
    xc = pos % W
    yc = (pos % HW) // W
    ones = jnp.ones((L,), jnp.bool_)
    rows = []
    for oy in (-1, 0, 1):
        for ox in (-1, 0, 1):
            vy = ones if oy == 0 else (yc >= 1 if oy == -1 else yc <= H - 2)
            vx = ones if ox == 0 else (xc >= 1 if ox == -1 else xc <= W - 2)
            rows.append(jnp.logical_and(vy, vx).astype(jnp.float32))
    masks = jnp.stack(rows, axis=0)                        # (9, L)

    mxu_dtype = jnp.bfloat16 if use_bf16_mxu else jnp.float32
    wslab, vslab, wseg, vseg = _pack_params(p1, p2, cin, gc, cout, mxu_dtype)

    const = lambda g: (0, 0)
    out = pl.pallas_call(
        functools.partial(
            dense_block_kernel, W=W, hw=HW, bt=bt, cin=cin, gc=gc, cout=cout,
            wseg=wseg, vseg=vseg, slope=0.2, mxu_dtype=mxu_dtype),
        out_shape=jax.ShapeDtypeStruct((G, cout, L), jnp.float32),
        grid=(G,),
        in_specs=[pl.BlockSpec((1, cin, L), lambda g: (g, 0, 0)),
                  pl.BlockSpec(masks.shape, const),
                  pl.BlockSpec(wslab.shape, const),
                  pl.BlockSpec(vslab.shape, const)],
        out_specs=pl.BlockSpec((1, cout, L), lambda g: (g, 0, 0)),
        compiler_params=pltpu.CompilerParams(
            dimension_semantics=("parallel",)),
    )(xg, masks, wslab, vslab)

    out = (out.reshape(G, cout, bt, HW).transpose(0, 2, 1, 3)
              .reshape(n_pad, cout, H, W))
    return out[:N]


# ----------------------------------------------------------------------------
# Deterministic parameter init (xavier_normal * 0.1, zero biases, IN affine
# = (1, 0)), matching DenseBlock(init='xavier').
# ----------------------------------------------------------------------------
def _xavier_conv(key, kh, kw, cin, cout, scale=0.1):
    fan_in, fan_out = cin * kh * kw, cout * kh * kw
    std = math.sqrt(2.0 / (fan_in + fan_out))
    return scale * std * jax.random.normal(key, (kh, kw, cin, cout), jnp.float32)


def make_unet_block_params(key, cin, cout):
    k1, k2, k3 = jax.random.split(key, 3)
    half = cout // 2
    return {
        "w1": _xavier_conv(k1, 3, 3, cin, cout),
        "b1": jnp.zeros((1, cout), jnp.float32),
        "w2": _xavier_conv(k2, 3, 3, cout, cout),
        "b2": jnp.zeros((1, cout), jnp.float32),
        "wid": _xavier_conv(k3, 1, 1, cin, cout)[0, 0],   # (Cin, Cout)
        "bid": jnp.zeros((1, cout), jnp.float32),
        "nw": jnp.ones((1, half), jnp.float32),
        "nb": jnp.zeros((1, half), jnp.float32),
    }


# ----------------------------------------------------------------------------
# Pure-JAX reference (for correctness check)
# ----------------------------------------------------------------------------
def _ref_unet_block(x, p, outer_slope):
    def conv3(inp, w, b):
        y = lax.conv_general_dilated(
            inp, w, (1, 1), "SAME",
            dimension_numbers=("NHWC", "HWIO", "NHWC"))
        return y + b.reshape(1, 1, 1, -1)

    out = conv3(x, p["w1"], p["b1"])
    half = out.shape[-1] // 2
    o1, o2 = out[..., :half], out[..., half:]
    mean = o1.mean(axis=(1, 2), keepdims=True)
    var = ((o1 - mean) ** 2).mean(axis=(1, 2), keepdims=True)
    o1 = (o1 - mean) * lax.rsqrt(var + 1e-5)
    o1 = o1 * p["nw"].reshape(1, 1, 1, -1) + p["nb"].reshape(1, 1, 1, -1)
    out = jnp.concatenate([o1, o2], axis=-1)
    out = jnp.where(out >= 0, out, 0.1 * out)
    out = conv3(out, p["w2"], p["b2"])
    out = jnp.where(out >= 0, out, 0.1 * out)
    idn = jnp.einsum("nhwc,co->nhwo", x, p["wid"]) + p["bid"].reshape(1, 1, 1, -1)
    out = out + idn
    return jnp.where(out >= 0, out, outer_slope * out)


def _ref_dense_block(x_nchw, p1, p2):
    x = jnp.transpose(x_nchw, (0, 2, 3, 1))
    x1 = _ref_unet_block(x, p1, 0.2)
    x2 = _ref_unet_block(x1, p2, 0.2)
    return jnp.transpose(x2, (0, 3, 1, 2))


# ----------------------------------------------------------------------------
if __name__ == "__main__":
    key = jax.random.PRNGKey(0)
    kx, kp1, kp2 = jax.random.split(key, 3)

    # DenseBlock(channel_in=4, channel_out=4, gc=16)
    channel_in, channel_out, gc = 4, 4, 16
    N, H, W = 4, 16, 16

    x = jax.random.normal(kx, (N, channel_in, H, W), jnp.float32)
    p1 = make_unet_block_params(kp1, channel_in, gc)
    p2 = make_unet_block_params(kp2, gc, channel_out)

    ref = _ref_dense_block(x, p1, p2)

    # f32 MXU path (exact parity): bt = N//2 = 2 samples/step, grid = 2.
    out = jax.block_until_ready(dense_block_forward(x, p1, p2))
    assert out.shape == (N, channel_out, H, W)
    err = float(jnp.max(jnp.abs(out - ref)))
    assert jnp.allclose(out, ref, atol=2e-4, rtol=2e-4), err

    # bf16 MXU-operand path (~2x MXU rate on v6e/v7x); looser tolerance,
    # elementwise math stays f32.
    out_bf16 = jax.block_until_ready(
        dense_block_forward(x, p1, p2, use_bf16_mxu=True))
    err_bf16 = float(jnp.max(jnp.abs(out_bf16 - ref)))
    assert jnp.allclose(out_bf16, ref, atol=5e-2, rtol=5e-2), err_bf16

    print("KERNEL_OK")
</pallas_src>

<mosaic_0001>
module attributes {stable_mosaic.version = 11 : i64} {
  func.func @dense_block_kernel(%arg0: i32, %arg1: memref<1x4x512xf32, #tpu.memory_space<vmem>>, %arg2: memref<9x512xf32, #tpu.memory_space<vmem>>, %arg3: memref<80x144xf32, #tpu.memory_space<vmem>>, %arg4: memref<136x1xf32, #tpu.memory_space<vmem>>, %arg5: memref<1x4x512xf32, #tpu.memory_space<vmem>>) attributes {dimension_semantics = [#tpu.dimension_semantics<parallel>], iteration_bounds = array<i64: 2>, scalar_prefetch = 0 : i64, scratch_operands = 0 : i64, tpu.core_type = #tpu.core_type<tc>, window_params = [{transform_indices = @transform_0, window_bounds = array<i64: 1, 4, 512>}, {pipeline_mode = #tpu.pipeline_mode<synchronous>, transform_indices = @transform_1, window_bounds = array<i64: 9, 512>}, {pipeline_mode = #tpu.pipeline_mode<synchronous>, transform_indices = @transform_2, window_bounds = array<i64: 80, 144>}, {pipeline_mode = #tpu.pipeline_mode<synchronous>, transform_indices = @transform_3, window_bounds = array<i64: 136, 1>}, {transform_indices = @transform_4, window_bounds = array<i64: 1, 4, 512>}]} {
    %c0 = arith.constant 0 : index
    %c0_0 = arith.constant 0 : index
    %0 = vector.load %arg2[%c0, %c0_0] : memref<9x512xf32, #tpu.memory_space<vmem>>, vector<9x512xf32>
    %c0_1 = arith.constant 0 : index
    %c0_2 = arith.constant 0 : index
    %c0_3 = arith.constant 0 : index
    %1 = vector.load %arg1[%c0_1, %c0_2, %c0_3] : memref<1x4x512xf32, #tpu.memory_space<vmem>>, vector<1x4x512xf32>
    %2 = vector.shape_cast %1 : vector<1x4x512xf32> to vector<4x512xf32>
    %c0_4 = arith.constant 0 : index
    %c0_5 = arith.constant 0 : index
    %3 = vector.load %arg3[%c0_4, %c0_5] : memref<80x144xf32, #tpu.memory_space<vmem>>, vector<32x36xf32>
    %c32 = arith.constant 32 : index
    %c0_6 = arith.constant 0 : index
    %4 = vector.load %arg3[%c32, %c0_6] : memref<80x144xf32, #tpu.memory_space<vmem>>, vector<16x144xf32>
    %c0_7 = arith.constant 0 : index
    %c0_8 = arith.constant 0 : index
    %5 = vector.load %arg4[%c0_7, %c0_8] : memref<136x1xf32, #tpu.memory_space<vmem>>, vector<32x1xf32>
    %c32_9 = arith.constant 32 : index
    %c0_10 = arith.constant 0 : index
    %6 = vector.load %arg4[%c32_9, %c0_10] : memref<136x1xf32, #tpu.memory_space<vmem>>, vector<16x1xf32>
    %c48 = arith.constant 48 : index
    %c0_11 = arith.constant 0 : index
    %7 = vector.load %arg4[%c48, %c0_11] : memref<136x1xf32, #tpu.memory_space<vmem>>, vector<16x1xf32>
    %c64 = arith.constant 64 : index
    %c0_12 = arith.constant 0 : index
    %8 = vector.load %arg4[%c64, %c0_12] : memref<136x1xf32, #tpu.memory_space<vmem>>, vector<16x1xf32>
    %c80 = arith.constant 80 : index
    %c0_13 = arith.constant 0 : index
    %9 = vector.load %arg4[%c80, %c0_13] : memref<136x1xf32, #tpu.memory_space<vmem>>, vector<16x1xf32>
    %c17_i32 = arith.constant 17 : i32
    %10 = tpu.dynamic_rotate %2 by %c17_i32 dim 1 : vector<4x512xf32>, i32 -> vector<4x512xf32>
    %11 = vector.extract_strided_slice %0 {offsets = [0, 0], sizes = [1, 512], strides = [1, 1]} : vector<9x512xf32> to vector<1x512xf32>
    %12 = vector.broadcast %11 : vector<1x512xf32> to vector<4x512xf32>
    %13 = arith.mulf %10, %12 : vector<4x512xf32>
    %c16_i32 = arith.constant 16 : i32
    %14 = tpu.dynamic_rotate %2 by %c16_i32 dim 1 : vector<4x512xf32>, i32 -> vector<4x512xf32>
    %15 = vector.extract_strided_slice %0 {offsets = [1, 0], sizes = [1, 512], strides = [1, 1]} : vector<9x512xf32> to vector<1x512xf32>
    %16 = vector.broadcast %15 : vector<1x512xf32> to vector<4x512xf32>
    %17 = arith.mulf %14, %16 : vector<4x512xf32>
    %c15_i32 = arith.constant 15 : i32
    %18 = tpu.dynamic_rotate %2 by %c15_i32 dim 1 : vector<4x512xf32>, i32 -> vector<4x512xf32>
    %19 = vector.extract_strided_slice %0 {offsets = [2, 0], sizes = [1, 512], strides = [1, 1]} : vector<9x512xf32> to vector<1x512xf32>
    %20 = vector.broadcast %19 : vector<1x512xf32> to vector<4x512xf32>
    %21 = arith.mulf %18, %20 : vector<4x512xf32>
    %c1_i32 = arith.constant 1 : i32
    %22 = tpu.dynamic_rotate %2 by %c1_i32 dim 1 : vector<4x512xf32>, i32 -> vector<4x512xf32>
    %23 = vector.extract_strided_slice %0 {offsets = [3, 0], sizes = [1, 512], strides = [1, 1]} : vector<9x512xf32> to vector<1x512xf32>
    %24 = vector.broadcast %23 : vector<1x512xf32> to vector<4x512xf32>
    %25 = arith.mulf %22, %24 : vector<4x512xf32>
    %c511_i32 = arith.constant 511 : i32
    %26 = tpu.dynamic_rotate %2 by %c511_i32 dim 1 : vector<4x512xf32>, i32 -> vector<4x512xf32>
    %27 = vector.extract_strided_slice %0 {offsets = [5, 0], sizes = [1, 512], strides = [1, 1]} : vector<9x512xf32> to vector<1x512xf32>
    %28 = vector.broadcast %27 : vector<1x512xf32> to vector<4x512xf32>
    %29 = arith.mulf %26, %28 : vector<4x512xf32>
    %c497_i32 = arith.constant 497 : i32
    %30 = tpu.dynamic_rotate %2 by %c497_i32 dim 1 : vector<4x512xf32>, i32 -> vector<4x512xf32>
    %31 = vector.extract_strided_slice %0 {offsets = [6, 0], sizes = [1, 512], strides = [1, 1]} : vector<9x512xf32> to vector<1x512xf32>
    %32 = vector.broadcast %31 : vector<1x512xf32> to vector<4x512xf32>
    %33 = arith.mulf %30, %32 : vector<4x512xf32>
    %c496_i32 = arith.constant 496 : i32
    %34 = tpu.dynamic_rotate %2 by %c496_i32 dim 1 : vector<4x512xf32>, i32 -> vector<4x512xf32>
    %35 = vector.extract_strided_slice %0 {offsets = [7, 0], sizes = [1, 512], strides = [1, 1]} : vector<9x512xf32> to vector<1x512xf32>
    %36 = vector.broadcast %35 : vector<1x512xf32> to vector<4x512xf32>
    %37 = arith.mulf %34, %36 : vector<4x512xf32>
    %c495_i32 = arith.constant 495 : i32
    %38 = tpu.dynamic_rotate %2 by %c495_i32 dim 1 : vector<4x512xf32>, i32 -> vector<4x512xf32>
    %39 = vector.extract_strided_slice %0 {offsets = [8, 0], sizes = [1, 512], strides = [1, 1]} : vector<9x512xf32> to vector<1x512xf32>
    %40 = vector.broadcast %39 : vector<1x512xf32> to vector<4x512xf32>
    %41 = arith.mulf %38, %40 : vector<4x512xf32>
    %42 = tpu.concatenate %13, %17, %21, %25, %2, %29, %33, %37, %41 in 0 : vector<4x512xf32>, vector<4x512xf32>, vector<4x512xf32>, vector<4x512xf32>, vector<4x512xf32>, vector<4x512xf32>, vector<4x512xf32>, vector<4x512xf32>, vector<4x512xf32> -> vector<36x512xf32>
    %cst = arith.constant dense<0.000000e+00> : vector<32x512xf32>
    %43 = tpu.matmul %3, %42, %cst {dimension_numbers = #tpu.dot_dimension_numbers<[1], [0], [0], [1], [0, 0, 1, 1], [], []>} : vector<32x36xf32>, vector<36x512xf32>, vector<32x512xf32> -> vector<32x512xf32>
    %44 = vector.broadcast %5 : vector<32x1xf32> to vector<32x512xf32>
    %45 = arith.addf %43, %44 : vector<32x512xf32>
    %46 = vector.extract_strided_slice %45 {offsets = [0, 0], sizes = [16, 512], strides = [1, 1]} : vector<32x512xf32> to vector<16x512xf32>
    %47 = vector.extract_strided_slice %45 {offsets = [16, 0], sizes = [16, 512], strides = [1, 1]} : vector<32x512xf32> to vector<16x512xf32>
    %48 = vector.extract_strided_slice %46 {offsets = [0, 0], sizes = [16, 256], strides = [1, 1]} : vector<16x512xf32> to vector<16x256xf32>
    %cst_14 = arith.constant dense<0.000000e+00> : vector<16xf32>
    %49 = vector.multi_reduction <add>, %48, %cst_14 [1] : vector<16x256xf32> to vector<16xf32>
    %50 = vector.shape_cast %49 : vector<16xf32> to vector<16x1xf32>
    %cst_15 = arith.constant 2.560000e+02 : f32
    %51 = vector.broadcast %cst_15 : f32 to vector<16x1xf32>
    %52 = arith.divf %50, %51 : vector<16x1xf32>
    %53 = arith.mulf %48, %48 : vector<16x256xf32>
    %cst_16 = arith.constant dense<0.000000e+00> : vector<16xf32>
    %54 = vector.multi_reduction <add>, %53, %cst_16 [1] : vector<16x256xf32> to vector<16xf32>
    %55 = vector.shape_cast %54 : vector<16xf32> to vector<16x1xf32>
    %cst_17 = arith.constant 2.560000e+02 : f32
    %56 = vector.broadcast %cst_17 : f32 to vector<16x1xf32>
    %57 = arith.divf %55, %56 : vector<16x1xf32>
    %58 = arith.mulf %52, %52 : vector<16x1xf32>
    %59 = arith.subf %57, %58 : vector<16x1xf32>
    %cst_18 = arith.constant 9.99999974E-6 : f32
    %60 = vector.broadcast %cst_18 : f32 to vector<16x1xf32>
    %61 = arith.addf %59, %60 : vector<16x1xf32>
    %62 = math.rsqrt %61 : vector<16x1xf32>
    %63 = arith.mulf %7, %62 : vector<16x1xf32>
    %64 = arith.addf %63, %9 : vector<16x1xf32>
    %65 = arith.mulf %52, %63 : vector<16x1xf32>
    %66 = arith.subf %8, %65 : vector<16x1xf32>
    %67 = vector.broadcast %64 : vector<16x1xf32> to vector<16x256xf32>
    %68 = arith.mulf %48, %67 : vector<16x256xf32>
    %69 = vector.broadcast %66 : vector<16x1xf32> to vector<16x256xf32>
    %70 = arith.addf %68, %69 : vector<16x256xf32>
    %71 = vector.extract_strided_slice %46 {offsets = [0, 256], sizes = [16, 256], strides = [1, 1]} : vector<16x512xf32> to vector<16x256xf32>
    %cst_19 = arith.constant dense<0.000000e+00> : vector<16xf32>
    %72 = vector.multi_reduction <add>, %71, %cst_19 [1] : vector<16x256xf32> to vector<16xf32>
    %73 = vector.shape_cast %72 : vector<16xf32> to vector<16x1xf32>
    %cst_20 = arith.constant 2.560000e+02 : f32
    %74 = vector.broadcast %cst_20 : f32 to vector<16x1xf32>
    %75 = arith.divf %73, %74 : vector<16x1xf32>
    %76 = arith.mulf %71, %71 : vector<16x256xf32>
    %cst_21 = arith.constant dense<0.000000e+00> : vector<16xf32>
    %77 = vector.multi_reduction <add>, %76, %cst_21 [1] : vector<16x256xf32> to vector<16xf32>
    %78 = vector.shape_cast %77 : vector<16xf32> to vector<16x1xf32>
    %cst_22 = arith.constant 2.560000e+02 : f32
    %79 = vector.broadcast %cst_22 : f32 to vector<16x1xf32>
    %80 = arith.divf %78, %79 : vector<16x1xf32>
    %81 = arith.mulf %75, %75 : vector<16x1xf32>
    %82 = arith.subf %80, %81 : vector<16x1xf32>
    %cst_23 = arith.constant 9.99999974E-6 : f32
    %83 = vector.broadcast %cst_23 : f32 to vector<16x1xf32>
    %84 = arith.addf %82, %83 : vector<16x1xf32>
    %85 = math.rsqrt %84 : vector<16x1xf32>
    %86 = arith.mulf %7, %85 : vector<16x1xf32>
    %87 = arith.addf %86, %9 : vector<16x1xf32>
    %88 = arith.mulf %75, %86 : vector<16x1xf32>
    %89 = arith.subf %8, %88 : vector<16x1xf32>
    %90 = vector.broadcast %87 : vector<16x1xf32> to vector<16x256xf32>
    %91 = arith.mulf %71, %90 : vector<16x256xf32>
    %92 = vector.broadcast %89 : vector<16x1xf32> to vector<16x256xf32>
    %93 = arith.addf %91, %92 : vector<16x256xf32>
    %94 = tpu.concatenate %70, %93 in 1 : vector<16x256xf32>, vector<16x256xf32> -> vector<16x512xf32>
    %cst_24 = arith.constant 1.000000e-01 : f32
    %95 = vector.broadcast %cst_24 : f32 to vector<16x512xf32>
    %96 = arith.mulf %95, %94 : vector<16x512xf32>
    %97 = arith.maximumf %94, %96 : vector<16x512xf32>
    %c17_i32_25 = arith.constant 17 : i32
    %98 = tpu.dynamic_rotate %97 by %c17_i32_25 dim 1 : vector<16x512xf32>, i32 -> vector<16x512xf32>
    %99 = vector.extract_strided_slice %0 {offsets = [0, 0], sizes = [1, 512], strides = [1, 1]} : vector<9x512xf32> to vector<1x512xf32>
    %100 = vector.broadcast %99 : vector<1x512xf32> to vector<16x512xf32>
    %101 = arith.mulf %98, %100 : vector<16x512xf32>
    %c16_i32_26 = arith.constant 16 : i32
    %102 = tpu.dynamic_rotate %97 by %c16_i32_26 dim 1 : vector<16x512xf32>, i32 -> vector<16x512xf32>
    %103 = vector.extract_strided_slice %0 {offsets = [1, 0], sizes = [1, 512], strides = [1, 1]} : vector<9x512xf32> to vector<1x512xf32>
    %104 = vector.broadcast %103 : vector<1x512xf32> to vector<16x512xf32>
    %105 = arith.mulf %102, %104 : vector<16x512xf32>
    %c15_i32_27 = arith.constant 15 : i32
    %106 = tpu.dynamic_rotate %97 by %c15_i32_27 dim 1 : vector<16x512xf32>, i32 -> vector<16x512xf32>
    %107 = vector.extract_strided_slice %0 {offsets = [2, 0], sizes = [1, 512], strides = [1, 1]} : vector<9x512xf32> to vector<1x512xf32>
    %108 = vector.broadcast %107 : vector<1x512xf32> to vector<16x512xf32>
    %109 = arith.mulf %106, %108 : vector<16x512xf32>
    %c1_i32_28 = arith.constant 1 : i32
    %110 = tpu.dynamic_rotate %97 by %c1_i32_28 dim 1 : vector<16x512xf32>, i32 -> vector<16x512xf32>
    %111 = vector.extract_strided_slice %0 {offsets = [3, 0], sizes = [1, 512], strides = [1, 1]} : vector<9x512xf32> to vector<1x512xf32>
    %112 = vector.broadcast %111 : vector<1x512xf32> to vector<16x512xf32>
    %113 = arith.mulf %110, %112 : vector<16x512xf32>
    %c511_i32_29 = arith.constant 511 : i32
    %114 = tpu.dynamic_rotate %97 by %c511_i32_29 dim 1 : vector<16x512xf32>, i32 -> vector<16x512xf32>
    %115 = vector.extract_strided_slice %0 {offsets = [5, 0], sizes = [1, 512], strides = [1, 1]} : vector<9x512xf32> to vector<1x512xf32>
    %116 = vector.broadcast %115 : vector<1x512xf32> to vector<16x512xf32>
    %117 = arith.mulf %114, %116 : vector<16x512xf32>
    %c497_i32_30 = arith.constant 497 : i32
    %118 = tpu.dynamic_rotate %97 by %c497_i32_30 dim 1 : vector<16x512xf32>, i32 -> vector<16x512xf32>
    %119 = vector.extract_strided_slice %0 {offsets = [6, 0], sizes = [1, 512], strides = [1, 1]} : vector<9x512xf32> to vector<1x512xf32>
    %120 = vector.broadcast %119 : vector<1x512xf32> to vector<16x512xf32>
    %121 = arith.mulf %118, %120 : vector<16x512xf32>
    %c496_i32_31 = arith.constant 496 : i32
    %122 = tpu.dynamic_rotate %97 by %c496_i32_31 dim 1 : vector<16x512xf32>, i32 -> vector<16x512xf32>
    %123 = vector.extract_strided_slice %0 {offsets = [7, 0], sizes = [1, 512], strides = [1, 1]} : vector<9x512xf32> to vector<1x512xf32>
    %124 = vector.broadcast %123 : vector<1x512xf32> to vector<16x512xf32>
    %125 = arith.mulf %122, %124 : vector<16x512xf32>
    %c495_i32_32 = arith.constant 495 : i32
    %126 = tpu.dynamic_rotate %97 by %c495_i32_32 dim 1 : vector<16x512xf32>, i32 -> vector<16x512xf32>
    %127 = vector.extract_strided_slice %0 {offsets = [8, 0], sizes = [1, 512], strides = [1, 1]} : vector<9x512xf32> to vector<1x512xf32>
    %128 = vector.broadcast %127 : vector<1x512xf32> to vector<16x512xf32>
    %129 = arith.mulf %126, %128 : vector<16x512xf32>
    %130 = tpu.concatenate %101, %105, %109, %113, %97, %117, %121, %125, %129 in 0 : vector<16x512xf32>, vector<16x512xf32>, vector<16x512xf32>, vector<16x512xf32>, vector<16x512xf32>, vector<16x512xf32>, vector<16x512xf32>, vector<16x512xf32>, vector<16x512xf32> -> vector<144x512xf32>
    %cst_33 = arith.constant dense<0.000000e+00> : vector<16x512xf32>
    %131 = tpu.matmul %4, %130, %cst_33 {dimension_numbers = #tpu.dot_dimension_numbers<[1], [0], [0], [1], [0, 0, 1, 1], [], []>} : vector<16x144xf32>, vector<144x512xf32>, vector<16x512xf32> -> vector<16x512xf32>
    %132 = vector.broadcast %6 : vector<16x1xf32> to vector<16x512xf32>
    %133 = arith.addf %131, %132 : vector<16x512xf32>
    %cst_34 = arith.constant 1.000000e-01 : f32
    %134 = vector.broadcast %cst_34 : f32 to vector<16x512xf32>
    %135 = arith.mulf %134, %133 : vector<16x512xf32>
    %136 = arith.maximumf %133, %135 : vector<16x512xf32>
    %137 = arith.addf %136, %47 : vector<16x512xf32>
    %cst_35 = arith.constant 2.000000e-01 : f32
    %138 = vector.broadcast %cst_35 : f32 to vector<16x512xf32>
    %139 = arith.mulf %138, %137 : vector<16x512xf32>
    %140 = arith.maximumf %137, %139 : vector<16x512xf32>
    %c48_36 = arith.constant 48 : index
    %c0_37 = arith.constant 0 : index
    %141 = vector.load %arg3[%c48_36, %c0_37] : memref<80x144xf32, #tpu.memory_space<vmem>>, vector<8x144xf32>
    %c64_38 = arith.constant 64 : index
    %c0_39 = arith.constant 0 : index
    %142 = vector.load %arg3[%c64_38, %c0_39] : memref<80x144xf32, #tpu.memory_space<vmem>>, vector<4x36xf32>
    %c96 = arith.constant 96 : index
    %c0_40 = arith.constant 0 : index
    %143 = vector.load %arg4[%c96, %c0_40] : memref<136x1xf32, #tpu.memory_space<vmem>>, vector<8x1xf32>
    %c104 = arith.constant 104 : index
    %c0_41 = arith.constant 0 : index
    %144 = vector.load %arg4[%c104, %c0_41] : memref<136x1xf32, #tpu.memory_space<vmem>>, vector<4x1xf32>
    %c112 = arith.constant 112 : index
    %c0_42 = arith.constant 0 : index
    %145 = vector.load %arg4[%c112, %c0_42] : memref<136x1xf32, #tpu.memory_space<vmem>>, vector<4x1xf32>
    %c120 = arith.constant 120 : index
    %c0_43 = arith.constant 0 : index
    %146 = vector.load %arg4[%c120, %c0_43] : memref<136x1xf32, #tpu.memory_space<vmem>>, vector<4x1xf32>
    %c128 = arith.constant 128 : index
    %c0_44 = arith.constant 0 : index
    %147 = vector.load %arg4[%c128, %c0_44] : memref<136x1xf32, #tpu.memory_space<vmem>>, vector<4x1xf32>
    %c17_i32_45 = arith.constant 17 : i32
    %148 = tpu.dynamic_rotate %140 by %c17_i32_45 dim 1 : vector<16x512xf32>, i32 -> vector<16x512xf32>
    %149 = vector.extract_strided_slice %0 {offsets = [0, 0], sizes = [1, 512], strides = [1, 1]} : vector<9x512xf32> to vector<1x512xf32>
    %150 = vector.broadcast %149 : vector<1x512xf32> to vector<16x512xf32>
    %151 = arith.mulf %148, %150 : vector<16x512xf32>
    %c16_i32_46 = arith.constant 16 : i32
    %152 = tpu.dynamic_rotate %140 by %c16_i32_46 dim 1 : vector<16x512xf32>, i32 -> vector<16x512xf32>
    %153 = vector.extract_strided_slice %0 {offsets = [1, 0], sizes = [1, 512], strides = [1, 1]} : vector<9x512xf32> to vector<1x512xf32>
    %154 = vector.broadcast %153 : vector<1x512xf32> to vector<16x512xf32>
    %155 = arith.mulf %152, %154 : vector<16x512xf32>
    %c15_i32_47 = arith.constant 15 : i32
    %156 = tpu.dynamic_rotate %140 by %c15_i32_47 dim 1 : vector<16x512xf32>, i32 -> vector<16x512xf32>
    %157 = vector.extract_strided_slice %0 {offsets = [2, 0], sizes = [1, 512], strides = [1, 1]} : vector<9x512xf32> to vector<1x512xf32>
    %158 = vector.broadcast %157 : vector<1x512xf32> to vector<16x512xf32>
    %159 = arith.mulf %156, %158 : vector<16x512xf32>
    %c1_i32_48 = arith.constant 1 : i32
    %160 = tpu.dynamic_rotate %140 by %c1_i32_48 dim 1 : vector<16x512xf32>, i32 -> vector<16x512xf32>
    %161 = vector.extract_strided_slice %0 {offsets = [3, 0], sizes = [1, 512], strides = [1, 1]} : vector<9x512xf32> to vector<1x512xf32>
    %162 = vector.broadcast %161 : vector<1x512xf32> to vector<16x512xf32>
    %163 = arith.mulf %160, %162 : vector<16x512xf32>
    %c511_i32_49 = arith.constant 511 : i32
    %164 = tpu.dynamic_rotate %140 by %c511_i32_49 dim 1 : vector<16x512xf32>, i32 -> vector<16x512xf32>
    %165 = vector.extract_strided_slice %0 {offsets = [5, 0], sizes = [1, 512], strides = [1, 1]} : vector<9x512xf32> to vector<1x512xf32>
    %166 = vector.broadcast %165 : vector<1x512xf32> to vector<16x512xf32>
    %167 = arith.mulf %164, %166 : vector<16x512xf32>
    %c497_i32_50 = arith.constant 497 : i32
    %168 = tpu.dynamic_rotate %140 by %c497_i32_50 dim 1 : vector<16x512xf32>, i32 -> vector<16x512xf32>
    %169 = vector.extract_strided_slice %0 {offsets = [6, 0], sizes = [1, 512], strides = [1, 1]} : vector<9x512xf32> to vector<1x512xf32>
    %170 = vector.broadcast %169 : vector<1x512xf32> to vector<16x512xf32>
    %171 = arith.mulf %168, %170 : vector<16x512xf32>
    %c496_i32_51 = arith.constant 496 : i32
    %172 = tpu.dynamic_rotate %140 by %c496_i32_51 dim 1 : vector<16x512xf32>, i32 -> vector<16x512xf32>
    %173 = vector.extract_strided_slice %0 {offsets = [7, 0], sizes = [1, 512], strides = [1, 1]} : vector<9x512xf32> to vector<1x512xf32>
    %174 = vector.broadcast %173 : vector<1x512xf32> to vector<16x512xf32>
    %175 = arith.mulf %172, %174 : vector<16x512xf32>
    %c495_i32_52 = arith.constant 495 : i32
    %176 = tpu.dynamic_rotate %140 by %c495_i32_52 dim 1 : vector<16x512xf32>, i32 -> vector<16x512xf32>
    %177 = vector.extract_strided_slice %0 {offsets = [8, 0], sizes = [1, 512], strides = [1, 1]} : vector<9x512xf32> to vector<1x512xf32>
    %178 = vector.broadcast %177 : vector<1x512xf32> to vector<16x512xf32>
    %179 = arith.mulf %176, %178 : vector<16x512xf32>
    %180 = tpu.concatenate %151, %155, %159, %163, %140, %167, %171, %175, %179 in 0 : vector<16x512xf32>, vector<16x512xf32>, vector<16x512xf32>, vector<16x512xf32>, vector<16x512xf32>, vector<16x512xf32>, vector<16x512xf32>, vector<16x512xf32>, vector<16x512xf32> -> vector<144x512xf32>
    %cst_53 = arith.constant dense<0.000000e+00> : vector<8x512xf32>
    %181 = tpu.matmul %141, %180, %cst_53 {dimension_numbers = #tpu.dot_dimension_numbers<[1], [0], [0], [1], [0, 0, 1, 1], [], []>} : vector<8x144xf32>, vector<144x512xf32>, vector<8x512xf32> -> vector<8x512xf32>
    %182 = vector.broadcast %143 : vector<8x1xf32> to vector<8x512xf32>
    %183 = arith.addf %181, %182 : vector<8x512xf32>
    %184 = vector.extract_strided_slice %183 {offsets = [0, 0], sizes = [4, 512], strides = [1, 1]} : vector<8x512xf32> to vector<4x512xf32>
    %185 = vector.extract_strided_slice %183 {offsets = [4, 0], sizes = [4, 512], strides = [1, 1]} : vector<8x512xf32> to vector<4x512xf32>
    %186 = vector.extract_strided_slice %184 {offsets = [0, 0], sizes = [4, 256], strides = [1, 1]} : vector<4x512xf32> to vector<4x256xf32>
    %cst_54 = arith.constant dense<0.000000e+00> : vector<4xf32>
    %187 = vector.multi_reduction <add>, %186, %cst_54 [1] : vector<4x256xf32> to vector<4xf32>
    %188 = vector.shape_cast %187 : vector<4xf32> to vector<4x1xf32>
    %cst_55 = arith.constant 2.560000e+02 : f32
    %189 = vector.broadcast %cst_55 : f32 to vector<4x1xf32>
    %190 = arith.divf %188, %189 : vector<4x1xf32>
    %191 = arith.mulf %186, %186 : vector<4x256xf32>
    %cst_56 = arith.constant dense<0.000000e+00> : vector<4xf32>
    %192 = vector.multi_reduction <add>, %191, %cst_56 [1] : vector<4x256xf32> to vector<4xf32>
    %193 = vector.shape_cast %192 : vector<4xf32> to vector<4x1xf32>
    %cst_57 = arith.constant 2.560000e+02 : f32
    %194 = vector.broadcast %cst_57 : f32 to vector<4x1xf32>
    %195 = arith.divf %193, %194 : vector<4x1xf32>
    %196 = arith.mulf %190, %190 : vector<4x1xf32>
    %197 = arith.subf %195, %196 : vector<4x1xf32>
    %cst_58 = arith.constant 9.99999974E-6 : f32
    %198 = vector.broadcast %cst_58 : f32 to vector<4x1xf32>
    %199 = arith.addf %197, %198 : vector<4x1xf32>
    %200 = math.rsqrt %199 : vector<4x1xf32>
    %201 = arith.mulf %145, %200 : vector<4x1xf32>
    %202 = arith.addf %201, %147 : vector<4x1xf32>
    %203 = arith.mulf %190, %201 : vector<4x1xf32>
    %204 = arith.subf %146, %203 : vector<4x1xf32>
    %205 = vector.broadcast %202 : vector<4x1xf32> to vector<4x256xf32>
    %206 = arith.mulf %186, %205 : vector<4x256xf32>
    %207 = vector.broadcast %204 : vector<4x1xf32> to vector<4x256xf32>
    %208 = arith.addf %206, %207 : vector<4x256xf32>
    %209 = vector.extract_strided_slice %184 {offsets = [0, 256], sizes = [4, 256], strides = [1, 1]} : vector<4x512xf32> to vector<4x256xf32>
    %cst_59 = arith.constant dense<0.000000e+00> : vector<4xf32>
    %210 = vector.multi_reduction <add>, %209, %cst_59 [1] : vector<4x256xf32> to vector<4xf32>
    %211 = vector.shape_cast %210 : vector<4xf32> to vector<4x1xf32>
    %cst_60 = arith.constant 2.560000e+02 : f32
    %212 = vector.broadcast %cst_60 : f32 to vector<4x1xf32>
    %213 = arith.divf %211, %212 : vector<4x1xf32>
    %214 = arith.mulf %209, %209 : vector<4x256xf32>
    %cst_61 = arith.constant dense<0.000000e+00> : vector<4xf32>
    %215 = vector.multi_reduction <add>, %214, %cst_61 [1] : vector<4x256xf32> to vector<4xf32>
    %216 = vector.shape_cast %215 : vector<4xf32> to vector<4x1xf32>
    %cst_62 = arith.constant 2.560000e+02 : f32
    %217 = vector.broadcast %cst_62 : f32 to vector<4x1xf32>
    %218 = arith.divf %216, %217 : vector<4x1xf32>
    %219 = arith.mulf %213, %213 : vector<4x1xf32>
    %220 = arith.subf %218, %219 : vector<4x1xf32>
    %cst_63 = arith.constant 9.99999974E-6 : f32
    %221 = vector.broadcast %cst_63 : f32 to vector<4x1xf32>
    %222 = arith.addf %220, %221 : vector<4x1xf32>
    %223 = math.rsqrt %222 : vector<4x1xf32>
    %224 = arith.mulf %145, %223 : vector<4x1xf32>
    %225 = arith.addf %224, %147 : vector<4x1xf32>
    %226 = arith.mulf %213, %224 : vector<4x1xf32>
    %227 = arith.subf %146, %226 : vector<4x1xf32>
    %228 = vector.broadcast %225 : vector<4x1xf32> to vector<4x256xf32>
    %229 = arith.mulf %209, %228 : vector<4x256xf32>
    %230 = vector.broadcast %227 : vector<4x1xf32> to vector<4x256xf32>
    %231 = arith.addf %229, %230 : vector<4x256xf32>
    %232 = tpu.concatenate %208, %231 in 1 : vector<4x256xf32>, vector<4x256xf32> -> vector<4x512xf32>
    %cst_64 = arith.constant 1.000000e-01 : f32
    %233 = vector.broadcast %cst_64 : f32 to vector<4x512xf32>
    %234 = arith.mulf %233, %232 : vector<4x512xf32>
    %235 = arith.maximumf %232, %234 : vector<4x512xf32>
    %c17_i32_65 = arith.constant 17 : i32
    %236 = tpu.dynamic_rotate %235 by %c17_i32_65 dim 1 : vector<4x512xf32>, i32 -> vector<4x512xf32>
    %237 = vector.extract_strided_slice %0 {offsets = [0, 0], sizes = [1, 512], strides = [1, 1]} : vector<9x512xf32> to vector<1x512xf32>
    %238 = vector.broadcast %237 : vector<1x512xf32> to vector<4x512xf32>
    %239 = arith.mulf %236, %238 : vector<4x512xf32>
    %c16_i32_66 = arith.constant 16 : i32
    %240 = tpu.dynamic_rotate %235 by %c16_i32_66 dim 1 : vector<4x512xf32>, i32 -> vector<4x512xf32>
    %241 = vector.extract_strided_slice %0 {offsets = [1, 0], sizes = [1, 512], strides = [1, 1]} : vector<9x512xf32> to vector<1x512xf32>
    %242 = vector.broadcast %241 : vector<1x512xf32> to vector<4x512xf32>
    %243 = arith.mulf %240, %242 : vector<4x512xf32>
    %c15_i32_67 = arith.constant 15 : i32
    %244 = tpu.dynamic_rotate %235 by %c15_i32_67 dim 1 : vector<4x512xf32>, i32 -> vector<4x512xf32>
    %245 = vector.extract_strided_slice %0 {offsets = [2, 0], sizes = [1, 512], strides = [1, 1]} : vector<9x512xf32> to vector<1x512xf32>
    %246 = vector.broadcast %245 : vector<1x512xf32> to vector<4x512xf32>
    %247 = arith.mulf %244, %246 : vector<4x512xf32>
    %c1_i32_68 = arith.constant 1 : i32
    %248 = tpu.dynamic_rotate %235 by %c1_i32_68 dim 1 : vector<4x512xf32>, i32 -> vector<4x512xf32>
    %249 = vector.extract_strided_slice %0 {offsets = [3, 0], sizes = [1, 512], strides = [1, 1]} : vector<9x512xf32> to vector<1x512xf32>
    %250 = vector.broadcast %249 : vector<1x512xf32> to vector<4x512xf32>
    %251 = arith.mulf %248, %250 : vector<4x512xf32>
    %c511_i32_69 = arith.constant 511 : i32
    %252 = tpu.dynamic_rotate %235 by %c511_i32_69 dim 1 : vector<4x512xf32>, i32 -> vector<4x512xf32>
    %253 = vector.extract_strided_slice %0 {offsets = [5, 0], sizes = [1, 512], strides = [1, 1]} : vector<9x512xf32> to vector<1x512xf32>
    %254 = vector.broadcast %253 : vector<1x512xf32> to vector<4x512xf32>
    %255 = arith.mulf %252, %254 : vector<4x512xf32>
    %c497_i32_70 = arith.constant 497 : i32
    %256 = tpu.dynamic_rotate %235 by %c497_i32_70 dim 1 : vector<4x512xf32>, i32 -> vector<4x512xf32>
    %257 = vector.extract_strided_slice %0 {offsets = [6, 0], sizes = [1, 512], strides = [1, 1]} : vector<9x512xf32> to vector<1x512xf32>
    %258 = vector.broadcast %257 : vector<1x512xf32> to vector<4x512xf32>
    %259 = arith.mulf %256, %258 : vector<4x512xf32>
    %c496_i32_71 = arith.constant 496 : i32
    %260 = tpu.dynamic_rotate %235 by %c496_i32_71 dim 1 : vector<4x512xf32>, i32 -> vector<4x512xf32>
    %261 = vector.extract_strided_slice %0 {offsets = [7, 0], sizes = [1, 512], strides = [1, 1]} : vector<9x512xf32> to vector<1x512xf32>
    %262 = vector.broadcast %261 : vector<1x512xf32> to vector<4x512xf32>
    %263 = arith.mulf %260, %262 : vector<4x512xf32>
    %c495_i32_72 = arith.constant 495 : i32
    %264 = tpu.dynamic_rotate %235 by %c495_i32_72 dim 1 : vector<4x512xf32>, i32 -> vector<4x512xf32>
    %265 = vector.extract_strided_slice %0 {offsets = [8, 0], sizes = [1, 512], strides = [1, 1]} : vector<9x512xf32> to vector<1x512xf32>
    %266 = vector.broadcast %265 : vector<1x512xf32> to vector<4x512xf32>
    %267 = arith.mulf %264, %266 : vector<4x512xf32>
    %268 = tpu.concatenate %239, %243, %247, %251, %235, %255, %259, %263, %267 in 0 : vector<4x512xf32>, vector<4x512xf32>, vector<4x512xf32>, vector<4x512xf32>, vector<4x512xf32>, vector<4x512xf32>, vector<4x512xf32>, vector<4x512xf32>, vector<4x512xf32> -> vector<36x512xf32>
    %cst_73 = arith.constant dense<0.000000e+00> : vector<4x512xf32>
    %269 = tpu.matmul %142, %268, %cst_73 {dimension_numbers = #tpu.dot_dimension_numbers<[1], [0], [0], [1], [0, 0, 1, 1], [], []>} : vector<4x36xf32>, vector<36x512xf32>, vector<4x512xf32> -> vector<4x512xf32>
    %270 = vector.broadcast %144 : vector<4x1xf32> to vector<4x512xf32>
    %271 = arith.addf %269, %270 : vector<4x512xf32>
    %cst_74 = arith.constant 1.000000e-01 : f32
    %272 = vector.broadcast %cst_74 : f32 to vector<4x512xf32>
    %273 = arith.mulf %272, %271 : vector<4x512xf32>
    %274 = arith.maximumf %271, %273 : vector<4x512xf32>
    %275 = arith.addf %274, %185 : vector<4x512xf32>
    %cst_75 = arith.constant 2.000000e-01 : f32
    %276 = vector.broadcast %cst_75 : f32 to vector<4x512xf32>
    %277 = arith.mulf %276, %275 : vector<4x512xf32>
    %278 = arith.maximumf %275, %277 : vector<4x512xf32>
    %c0_76 = arith.constant 0 : index
    %c0_77 = arith.constant 0 : index
    %c0_78 = arith.constant 0 : index
    %279 = vector.load %arg5[%c0_76, %c0_77, %c0_78] : memref<1x4x512xf32, #tpu.memory_space<vmem>>, vector<1x4x512xf32>
    %280 = vector.shape_cast %279 : vector<1x4x512xf32> to vector<4x512xf32>
    %281 = vector.shape_cast %278 : vector<4x512xf32> to vector<1x4x512xf32>
    tpu.vector_store %arg5[%c0_76, %c0_77, %c0_78], %281 {strides = array<i32>} : memref<1x4x512xf32, #tpu.memory_space<vmem>>, vector<1x4x512xf32>,
    return
  }
  func.func @transform_0(%arg0: i32) -> (i32, i32, i32) {
    %c0_i32 = arith.constant 0 : i32
    %c0_i32_0 = arith.constant 0 : i32
    %c0_i32_1 = arith.constant 0 : i32
    return %arg0, %c0_i32, %c0_i32_0 : i32, i32, i32
  }
  func.func @transform_1(%arg0: i32) -> (i32, i32) {
    %c0_i32 = arith.constant 0 : i32
    %c0_i32_0 = arith.constant 0 : i32
    %c0_i32_1 = arith.constant 0 : i32
    return %c0_i32, %c0_i32_0 : i32, i32
  }
  func.func @transform_2(%arg0: i32) -> (i32, i32) {
    %c0_i32 = arith.constant 0 : i32
    %c0_i32_0 = arith.constant 0 : i32
    %c0_i32_1 = arith.constant 0 : i32
    return %c0_i32, %c0_i32_0 : i32, i32
  }
  func.func @transform_3(%arg0: i32) -> (i32, i32) {
    %c0_i32 = arith.constant 0 : i32
    %c0_i32_0 = arith.constant 0 : i32
    %c0_i32_1 = arith.constant 0 : i32
    return %c0_i32, %c0_i32_0 : i32, i32
  }
  func.func @transform_4(%arg0: i32) -> (i32, i32, i32) {
    %c0_i32 = arith.constant 0 : i32
    %c0_i32_0 = arith.constant 0 : i32
    %c0_i32_1 = arith.constant 0 : i32
    return %arg0, %c0_i32, %c0_i32_0 : i32, i32, i32
  }
}

</mosaic_0001>

<bundles_post_ra>
// kernel: dense_block_forward.1
= control target key start
LH: loop header
LB: loop body
LE: loop exit
PB: predicated region body
PF: predicated region fallthrough
CT: control target
= control target key end

     0   :  { %s2647_s15 = smov 0   ;;  %s4249_s0 = inlined_call_operand.vmem [shape: f32[2,4,512], index: 0, kind: input, shape index: {}]   ;;  %s4250_s1 = inlined_call_operand.vmem [shape: f32[9,512], index: 1, kind: input, shape index: {}]   ;;  %s4251_s2 = inlined_call_operand.vmem [shape: f32[80,144], index: 2, kind: input, shape index: {}]   ;;  %s4252_s3 = inlined_call_operand.vmem [shape: f32[136,1], index: 3, kind: input, shape index: {}]   ;;  %s4253_s4 = inlined_call_operand.vmem [shape: f32[2,4,512], index: 4, kind: output, shape index: {}]  }
   0x1 LB: > { %s2345_s16 = sadd.s32 4294967295, %s2610_s15   ;;  %p2349_p0 = scmp.ge.s32.totalorder %s2610_s15, 1  ;;  %s2610_s15 = sphi %s2647_s15, %s14_s15  }
   0x2   : > { %p162_p1 = scmp.lt.s32.totalorder %s2610_s15, 3 }
   0x4   : > { %p163_p2 = pnand %p2349_p0, %p162_p1 }
   0x6   : > { %166 = sbr.rel (%p163_p2) target bundleno = 2386 (0x952), region = 36 }
   0xd   : > { %p188_p3 = scmp.lt.s32.totalorder %s2345_s16, 1  ;;  %s2612_s21 = smov 16   ;;  %v4254_v4 = vmov 0.0   ;;  %v2621_v5 = vmov 0   ;;  %v216_v6 = vld [vmem:[%s4252_s3] sm:$0xff]  ;;  %v217_v7 = vld [vmem:[%s4252_s3 + $0x8] sm:$0xff]  ;;  %v242_v10 = vlaneseq }
   0xe   : > { %s2613_s22 = smov 1   ;;  %s2614_s23 = smov 17   ;;  %674 = vmatprep.mubr.f32.mxu0 %v4254_v4  ;;  %763 = vmatprep.mubr.f32.mxu1 %v4254_v4  ;;  %v2755_v18 = vld [vmem:[%s4250_s1] sm:$0xff]  ;;  %v2761_v22 = vld [vmem:[%s4250_s1 + $0x18] sm:$0xff]  ;;  %v2766_v23 = vld [vmem:[%s4250_s1 + $0x8] sm:$0xff]  ;;  %vm548_vm4 = vcmask 1043456  }
   0xf   : > { %s4356_s16 = smov (!%p188_p3, %s2345_s16), 1  ;;  %s2615_s24 = smov 15   ;;  %2580 = vset.pattern.permute.xlu0 %v2621_v5  ;;  %2581 = vset.pattern.permute.xlu1 %v2621_v5  ;;  %v2747_v13 = vshrl.u32 %v242_v10, 7  ;;  %v2749_v16 = vand.u32 127, %v242_v10  ;;  %v2772_v24 = vld [vmem:[%s4250_s1 + $0x10] sm:$0xff]  ;;  %vm585_vm9 = vcmask 293888  }
  0x10   : > { %s2384_s17 = sshll.u32 %s4356_s16, 4  ;;  %s2616_s25 = smov 127   ;;  %vm1199_vm10 = vcmask 130048  }
  0x11   : > { %s192_s20 = scalar_lea.vmem %s4249_s0, %s2384_s17  ;;  %s2617_s26 = smov 112   ;;  %v284_v17 = vsub.s32 1, %v2747_v13  ;;  %v350_v19 = vsub.s32 3, %v2747_v13  ;;  %vm244_vm0 = vcmp.lt.s32.totalorder %v2749_v16, 17  ;;  %v251_v25 = vsub.s32 0, %v2747_v13 }
  0x12   : > { %v2663_v0 = vld [vmem:[%s192_s20 + $0x8] sm:$0xff]  ;;  %v2665_v1 = vld [vmem:[%s192_s20] sm:$0xff]  ;;  %s2618_s27 = smov 113   ;;  %s2620_s28 = smov 111   ;;  %vm277_vm1 = vcmp.lt.s32.totalorder %v2749_v16, 16  ;;  %vm310_vm2 = vcmp.lt.s32.totalorder %v2749_v16, 15 }
  0x13   : > { %273 = vrot.lane.b32.xlu1 %v2663_v0, %s2612_s21  ;;  %269 = vrot.lane.b32.xlu0 %v2665_v1, %s2612_s21  ;;  %v2673_v2 = vcombine.high %v2663_v0, %v2663_v0  ;;  %v2681_v3 = vcombine.high %v2665_v1, %v2665_v1  ;;  %v2777_v26 = vrot.slane %v2755_v18, %v284_v17  ;;  %vm343_vm3 = vcmp.lt.s32.totalorder %v2749_v16, 1  ;;  %s197_s10 = scalar_lea.vmem %s4253_s4, %s2384_s17 }
  0x14   : > { %v2782_v27 = vrot.slane %v2761_v22, %v284_v17  ;;  %v2785_v28 = vrot.slane %v2766_v23, %v350_v19  ;;  %v2788_v29 = vrot.slane %v2766_v23, %v284_v17  ;;  %v317_v32 = vsub.s32 2, %v2747_v13 }
  0x15   : > { %v2792_v33 = vrot.slane %v2772_v24, %v284_v17  ;;  %v2795_v34 = vrot.slane %v2755_v18, %v350_v19  ;;  %v2798_v35 = vrot.slane %v2772_v24, %v350_v19  ;;  %v2801_v36 = vrot.slane %v2761_v22, %v350_v19 }
  0x16   : > { %4298 = vst [vmem:[#allocation2_spill] sm:$0xff] %v2788_v29  ;;  %v2808_v39 = vrot.slane %v2766_v23, %v251_v25  ;;  %v2811_v40 = vrot.slane %v2755_v18, %v251_v25  ;;  %v2818_v43 = vrot.slane %v2772_v24, %v251_v25  ;;  %v2825_v47 = vrot.slane %v2761_v22, %v251_v25 }
  0x17   : > { %275 = vrot.lane.b32.xlu1 %v2673_v2, %s2612_s21  ;;  %335 = vrot.lane.b32.xlu0 %v2665_v1, %s2613_s22  ;;  %v2828_v49 = vrot.slane %v2766_v23, %v317_v32  ;;  %v2839_v56 = vrot.slane %v2755_v18, %v317_v32  ;;  %v2842_v57 = vrot.slane %v2772_v24, %v317_v32  ;;  %vm376_vm5 = vcmp.lt.s32.totalorder %v2749_v16, 127 }
  0x18   : > { %4299 = vst [vmem:[#allocation3_spill] sm:$0xff] %v2808_v39  ;;  %4300 = vst [vmem:[#allocation4_spill] sm:$0xff] %v2811_v40  ;;  %v2849_v61 = vrot.slane %v2761_v22, %v317_v32  ;;  %vm442_vm6 = vcmp.lt.s32.totalorder %v2749_v16, 112  ;;  %vm409_vm7 = vcmp.lt.s32.totalorder %v2749_v16, 113  ;;  %vm475_vm8 = vcmp.lt.s32.totalorder %v2749_v16, 111 }
  0x19   : > { %4301 = vst [vmem:[#allocation5_spill] sm:$0xff] %v2825_v47  ;;  %v2603_v16 = vld [vmem:[%s4250_s1 + $0x20] ss:$0 sm:$0xff] }
  0x1b   : > { %337 = vrot.lane.b32.xlu1 %v2681_v3, %s2613_s22  ;;  %271 = vrot.lane.b32.xlu0 %v2681_v3, %s2612_s21 }
  0x1f   : > { %341 = vrot.lane.b32.xlu1 %v2673_v2, %s2613_s22  ;;  %339 = vrot.lane.b32.xlu0 %v2663_v0, %s2613_s22 }
  0x23   : > { %236 = vrot.lane.b32.xlu1 %v2681_v3, %s2614_s23  ;;  %234 = vrot.lane.b32.xlu0 %v2665_v1, %s2614_s23 }
  0x27   : > { %240 = vrot.lane.b32.xlu1 %v2673_v2, %s2614_s23  ;;  %238 = vrot.lane.b32.xlu0 %v2663_v0, %s2614_s23 }
  0x2b   : > { %304 = vrot.lane.b32.xlu1 %v2681_v3, %s2615_s24  ;;  %302 = vrot.lane.b32.xlu0 %v2665_v1, %s2615_s24 }
  0x2f   : > { %308 = vrot.lane.b32.xlu1 %v2673_v2, %s2615_s24  ;;  %306 = vrot.lane.b32.xlu0 %v2663_v0, %s2615_s24 }
  0x33   : > { %370 = vrot.lane.b32.xlu1 %v2681_v3, %s2616_s25  ;;  %368 = vrot.lane.b32.xlu0 %v2665_v1, %s2616_s25 }
  0x37   : > { %374 = vrot.lane.b32.xlu1 %v2673_v2, %s2616_s25  ;;  %372 = vrot.lane.b32.xlu0 %v2663_v0, %s2616_s25 }
  0x3b   : > { %436 = vrot.lane.b32.xlu1 %v2681_v3, %s2617_s26  ;;  %434 = vrot.lane.b32.xlu0 %v2665_v1, %s2617_s26 }
  0x3f   : > { %440 = vrot.lane.b32.xlu1 %v2673_v2, %s2617_s26  ;;  %438 = vrot.lane.b32.xlu0 %v2663_v0, %s2617_s26 }
  0x43   : > { %403 = vrot.lane.b32.xlu1 %v2681_v3, %s2618_s27  ;;  %401 = vrot.lane.b32.xlu0 %v2665_v1, %s2618_s27 }
  0x47   : > { %407 = vrot.lane.b32.xlu1 %v2673_v2, %s2618_s27  ;;  %405 = vrot.lane.b32.xlu0 %v2663_v0, %s2618_s27 }
  0x4b   : > { %469 = vrot.lane.b32.xlu1 %v2681_v3, %s2620_s28  ;;  %467 = vrot.lane.b32.xlu0 %v2665_v1, %s2620_s28 }
  0x4f   : > { %473 = vrot.lane.b32.xlu1 %v2673_v2, %s2620_s28  ;;  %471 = vrot.lane.b32.xlu0 %v2663_v0, %s2620_s28 }
  0x53   : > { %567 = vperm.xlu0 %2580, %v216_v6   ;;  %572 = vperm.xlu1 %2581, %v217_v7  }
  0x85   : > { %v274_v8 = vpop.permute.xlu1 %273  ;;  %v270_v9 = vpop.permute.xlu0 %269 }
  0x89   : > { %v276_v11 = vpop.permute.xlu1 %275  ;;  %v336_v12 = vpop.permute.xlu0 %335 }
  0x8a   : > { %v278_v37 = vsel %vm277_vm1, %v274_v8, %v276_v11  ;;  %v281_v38 = vsel %vm277_vm1, %v276_v11, %v270_v9 }
  0x8b   : > { %v298_v50 = vmul.f32 %v2777_v26, %v281_v38  ;;  %v301_v51 = vmul.f32 %v2782_v27, %v278_v37 }
  0x8d   : > { %v338_v14 = vpop.permute.xlu1 %337  ;;  %v272_v15 = vpop.permute.xlu0 %271  ;;  %v507_v10 = vrot.slane %v301_v51, 4 }
  0x8e   : > { %v346_v41 = vsel %vm343_vm3, %v336_v12, %v338_v14  ;;  %v280_v42 = vsel %vm277_vm1, %v270_v9, %v272_v15  ;;  %v279_v44 = vsel %vm277_vm1, %v272_v15, %v274_v8  ;;  %v504_v9 = vrot.slane %v298_v50, 4 }
  0x8f   : > { %v365_v54 = vmul.f32 %v2785_v28, %v346_v41  ;;  %v299_v55 = vmul.f32 %v2788_v29, %v280_v42  ;;  %v300_v58 = vmul.f32 %v2792_v33, %v279_v44 }
  0x91   : > { %v342_v20 = vpop.permute.xlu1 %341  ;;  %v340_v21 = vpop.permute.xlu0 %339  ;;  %v505_v15 = vrot.slane %v299_v55, 4 }
  0x92   : > { %v347_v45 = vsel %vm343_vm3, %v342_v20, %v336_v12  ;;  %v345_v52 = vsel %vm343_vm3, %v338_v14, %v340_v21  ;;  %v344_v60 = vsel %vm343_vm3, %v340_v21, %v342_v20  ;;  %v517_v14 = vrot.slane %v365_v54, 4 }
  0x93   : > { %v364_v59 = vmul.f32 %v2795_v34, %v347_v45  ;;  %v366_v62 = vmul.f32 %v2798_v35, %v345_v52  ;;  %v367_v17 = vmul.f32 %v2801_v36, %v344_v60  ;;  %v506_v20 = vrot.slane %v300_v58, 4 }
  0x95   : > { %v237_v30 = vpop.permute.xlu1 %236  ;;  %v235_v31 = vpop.permute.xlu0 %234  ;;  %v516_v21 = vrot.slane %v364_v59, 4  ;;  %v518_v32 = vrot.slane %v366_v62, 4  ;;  %v519_v50 = vrot.slane %v367_v17, 4 }
  0x96   : > { %v247_v53 = vsel %vm244_vm0, %v235_v31, %v237_v30 }
  0x97   : > { %v266_v63 = vmul.f32 %v2808_v39, %v247_v53 }
  0x99   : > { %v241_v46 = vpop.permute.xlu1 %240  ;;  %v239_v48 = vpop.permute.xlu0 %238  ;;  %v550_v41 = vsel %vm548_vm4, %v266_v63, %v505_v15 }
  0x9a   : > { %v248_v5 = vsel %vm244_vm0, %v241_v46, %v235_v31  ;;  %v245_v6 = vsel %vm244_vm0, %v239_v48, %v241_v46  ;;  %v246_v11 = vsel %vm244_vm0, %v237_v30, %v239_v48 }
  0x9b   : > { %v265_v25 = vmul.f32 %v2811_v40, %v248_v5  ;;  %v268_v31 = vmul.f32 %v2825_v47, %v245_v6  ;;  %v267_v37 = vmul.f32 %v2818_v43, %v246_v11 }
  0x9d   : > { %v305_v7 = vpop.permute.xlu1 %304  ;;  %v303_v8 = vpop.permute.xlu0 %302  ;;  %v549_v54 = vsel %vm548_vm4, %v265_v25, %v504_v9  ;;  %v552_v55 = vsel %vm548_vm4, %v268_v31, %v507_v10  ;;  %v551_v63 = vsel %vm548_vm4, %v267_v37, %v506_v20  ;;  %v383_v10 = vsub.s32 5, %v2747_v13 }
  0x9e   : > { %v313_v12 = vsel %vm310_vm2, %v303_v8, %v305_v7  ;;  %v416_v31 = vsub.s32 6, %v2747_v13 }
  0x9f   : > { %v332_v19 = vmul.f32 %v2828_v49, %v313_v12  ;;  %v449_v12 = vsub.s32 7, %v2747_v13  ;;  %v2888_v17 = vrot.slane %v2755_v18, %v383_v10  ;;  %v2894_v20 = vrot.slane %v2766_v23, %v383_v10 }
  0xa1   : > { %v309_v38 = vpop.permute.xlu1 %308  ;;  %v307_v30 = vpop.permute.xlu0 %306  ;;  %v554_v42 = vsel %vm548_vm4, %v332_v19, %v517_v14  ;;  %v2891_v19 = vrot.slane %v2761_v22, %v383_v10  ;;  %v2900_v25 = vrot.slane %v2755_v18, %v449_v12 }
  0xa2   : > { %v314_v44 = vsel %vm310_vm2, %v309_v38, %v303_v8  ;;  %v311_v45 = vsel %vm310_vm2, %v307_v30, %v309_v38  ;;  %v312_v46 = vsel %vm310_vm2, %v305_v7, %v307_v30  ;;  %v2386_v48 = vpack.c.bf16 %v554_v42, %v550_v41 }
  0xa3   : > { %v331_v51 = vmul.f32 %v2839_v56, %v314_v44  ;;  %v333_v52 = vmul.f32 %v2842_v57, %v312_v46  ;;  %v334_v53 = vmul.f32 %v2849_v61, %v311_v45  ;;  %4302 = vst [vmem:[#allocation6_spill] sm:$0xff] %v2900_v25  ;;  %v2908_v38 = vrot.slane %v2761_v22, %v449_v12 }
  0xa4   : > { %2387 = vmatprep.subr.bf16.mxu0 %v2386_v48  ;;  %v2911_v41 = vrot.slane %v2766_v23, %v449_v12  ;;  %v2923_v48 = vrot.slane %v2772_v24, %v449_v12 }
  0xa5   : > { %v371_v58 = vpop.permute.xlu1 %370  ;;  %v369_v59 = vpop.permute.xlu0 %368  ;;  %v553_v60 = vsel %vm548_vm4, %v331_v51, %v516_v21  ;;  %v556_v62 = vsel %vm548_vm4, %v334_v53, %v519_v50  ;;  %v555_v5 = vsel %vm548_vm4, %v333_v52, %v518_v32  ;;  %v2897_v21 = vrot.slane %v2772_v24, %v383_v10  ;;  %4303 = vst [vmem:[#allocation7_spill] sm:$0xff] %v2908_v38 }
  0xa6   : > { %v2388_v6 = vpack.c.bf16 %v553_v60, %v549_v54  ;;  %v2394_v7 = vpack.c.bf16 %v556_v62, %v552_v55  ;;  %v2396_v8 = vpack.c.bf16 %v555_v5, %v551_v63  ;;  %4304 = vst [vmem:[#allocation8_spill] sm:$0xff] %v2911_v41  ;;  %v379_v44 = vsel %vm376_vm5, %v369_v59, %v371_v58 }
  0xa7   : > { %4305 = vst [vmem:[#allocation9_spill] sm:$0xff] %v2923_v48  ;;  %v2932_v54 = vrot.slane %v2755_v18, %v416_v31  ;;  %v397_v55 = vmul.f32 %v2888_v17, %v379_v44  ;;  %v2943_v18 = vrot.slane %v2761_v22, %v416_v31 }
  0xa8   : > { %2389 = vmatpush1.bf16.msra.mxu0 %v2388_v6  ;;  %2395 = vmatprep.subr.bf16.mxu1 %v2394_v7 }
  0xa9   : > { %v375_v11 = vpop.permute.xlu1 %374  ;;  %2397 = vmatpush1.bf16.msra.mxu1 %v2396_v8  ;;  %v373_v9 = vpop.permute.xlu0 %372  ;;  %4306 = vst [vmem:[#allocation10_spill] sm:$0xff] %v2932_v54  ;;  %4307 = vst [vmem:[#allocation11_spill] sm:$0xff] %v2943_v18  ;;  %v2946_v8 = vrot.slane %v2766_v23, %v416_v31 }
  0xaa   : > { %v380_v32 = vsel %vm376_vm5, %v375_v11, %v369_v59  ;;  %v378_v37 = vsel %vm376_vm5, %v371_v58, %v373_v9  ;;  %v377_v13 = vsel %vm376_vm5, %v373_v9, %v375_v11  ;;  %v2949_v11 = vrot.slane %v2772_v24, %v416_v31 }
  0xab   : > { %v400_v51 = vmul.f32 %v2891_v19, %v380_v32  ;;  %v398_v52 = vmul.f32 %v2894_v20, %v378_v37  ;;  %v399_v58 = vmul.f32 %v2897_v21, %v377_v13  ;;  %4308 = vst [vmem:[#allocation12_spill] sm:$0xff] %v2946_v8 }
  0xac   : > { %4309 = vst [vmem:[#allocation13_spill] sm:$0xff] %v2949_v11 }
  0xad   : > { %v437_v14 = vpop.permute.xlu1 %436  ;;  %v435_v15 = vpop.permute.xlu0 %434  ;;  %v531_v9 = vrot.slane %v400_v51, 4  ;;  %v529_v10 = vrot.slane %v398_v52, 4 }
  0xae   : > { %v445_v45 = vsel %vm442_vm6, %v435_v15, %v437_v14 }
  0xaf   : > { %v463_v59 = vmul.f32 %v2900_v25, %v445_v45  ;;  %v560_v51 = vsel %vm548_vm4, %v2673_v2, %v531_v9  ;;  %v2355_v9 = vld [vmem:[%s4250_s1 + $0x28] ss:$0 sm:$0xff] }
  0xb1   : > { %v441_v30 = vpop.permute.xlu1 %440  ;;  %v439_v42 = vpop.permute.xlu0 %438  ;;  %v540_v32 = vrot.slane %v463_v59, 4 }
  0xb2   : > { %v446_v46 = vsel %vm442_vm6, %v441_v30, %v435_v15  ;;  %v444_v50 = vsel %vm442_vm6, %v437_v14, %v439_v42  ;;  %v443_v53 = vsel %vm442_vm6, %v439_v42, %v441_v30  ;;  %v528_v14 = vrot.slane %v397_v55, 4 }
  0xb3   : > { %v466_v60 = vmul.f32 %v2908_v38, %v446_v46  ;;  %v464_v5 = vmul.f32 %v2911_v41, %v444_v50  ;;  %v465_v7 = vmul.f32 %v2923_v48, %v443_v53  ;;  %v530_v15 = vrot.slane %v399_v58, 4 }
  0xb4   : > { %v558_v50 = vsel %vm548_vm4, %v2681_v3, %v529_v10  ;;  %v557_v3 = vsel %vm548_vm4, %v2665_v1, %v528_v14  ;;  %v2986_v1 = vld [vmem:[%s4250_s1 + $0x20] ss:$0 sm:$0xff] }
  0xb5   : > { %v404_v62 = vpop.permute.xlu1 %403  ;;  %v402_v63 = vpop.permute.xlu0 %401  ;;  %v543_v37 = vrot.slane %v466_v60, 4  ;;  %v541_v44 = vrot.slane %v464_v5, 4  ;;  %v542_v31 = vrot.slane %v465_v7, 4  ;;  %v559_v60 = vsel %vm548_vm4, %v2663_v0, %v530_v15  ;;  %v2357_v7 = vld [vmem:[%s4250_s1 + $0x38] ss:$0 sm:$0xff] }
  0xb6   : > { %v412_v6 = vsel %vm409_vm7, %v402_v63, %v404_v62  ;;  %v2356_v0 = vld [vmem:[%s4250_s1 + $0x30] ss:$0 sm:$0xff] }
  0xb7   : > { %v430_v12 = vmul.f32 %v2932_v54, %v412_v6 }
  0xb9   : > { %v408_v30 = vpop.permute.xlu1 %407  ;;  %v406_v42 = vpop.permute.xlu0 %405  ;;  %v561_v52 = vsel %vm548_vm4, %v430_v12, %v540_v32 }
  0xba   : > { %v413_v22 = vsel %vm409_vm7, %v408_v30, %v402_v63  ;;  %v410_v23 = vsel %vm409_vm7, %v406_v42, %v408_v30  ;;  %v411_v24 = vsel %vm409_vm7, %v404_v62, %v406_v42  ;;  %v2392_v2 = vpack.c.bf16 %v561_v52, %v557_v3 }
  0xbb   : > { %v433_v13 = vmul.f32 %v2943_v18, %v413_v22  ;;  %v431_v45 = vmul.f32 %v2946_v8, %v411_v24  ;;  %v432_v46 = vmul.f32 %v2949_v11, %v410_v23  ;;  %v208_v23 = vld [vmem:[%s4251_s2] sm:$0xff]  ;;  %v209_v24 = vld [vmem:[%s4251_s2 + $0x10] sm:$0xff] }
  0xbd   : > { %v470_v53 = vpop.permute.xlu1 %469  ;;  %v468_v55 = vpop.permute.xlu0 %467  ;;  %v562_v58 = vsel %vm548_vm4, %v431_v45, %v541_v44  ;;  %v564_v59 = vsel %vm548_vm4, %v433_v13, %v543_v37  ;;  %v563_v62 = vsel %vm548_vm4, %v432_v46, %v542_v31 }
  0xbe   : > { %v2390_v63 = vpack.c.bf16 %v562_v58, %v558_v50  ;;  %v2398_v5 = vpack.c.bf16 %v564_v59, %v560_v51  ;;  %v2400_v6 = vpack.c.bf16 %v563_v62, %v559_v60  ;;  %v478_v10 = vsel %vm475_vm8, %v468_v55, %v470_v53 }
  0xbf   : > { %v496_v22 = vmul.f32 %v2986_v1, %v478_v10 }
  0xc0   : > { %2391 = vmatprep.subr.bf16.mxu0 %v2390_v63  ;;  %2399 = vmatprep.subr.bf16.mxu1 %v2398_v5 }
  0xc1   : > { %v474_v12 = vpop.permute.xlu1 %473  ;;  %2393 = vmatpush1.bf16.msra.mxu0 %v2392_v2  ;;  %2401 = vmatpush1.bf16.msra.mxu1 %v2400_v6  ;;  %v472_v14 = vpop.permute.xlu0 %471 }
  0xc2   : > { %v479_v15 = vsel %vm475_vm8, %v474_v12, %v468_v55  ;;  %v476_v32 = vsel %vm475_vm8, %v472_v14, %v474_v12  ;;  %v477_v37 = vsel %vm475_vm8, %v470_v53, %v472_v14 }
  0xc3   : > { %v499_v30 = vmul.f32 %v2357_v7, %v479_v15  ;;  %v497_v42 = vmul.f32 %v2355_v9, %v477_v37  ;;  %v498_v44 = vmul.f32 %v2356_v0, %v476_v32 }
  0xc5   : > { %2358 = vmatprep.subr.msk.mxu0 %vm548_vm4, %v497_v42  ;;  %2364 = vmatprep.subr.msk.mxu1 %vm548_vm4, %v499_v30 }
  0xc6   : > { %2359 = vmatpush1.msk.msra.mxu0 %vm548_vm4, %v496_v22  ;;  %2365 = vmatpush1.msk.msra.mxu1 %vm548_vm4, %v498_v44 }
  0xc7   : > { %2360 = vmatmul.mubr.msk.f32.vlgmr.msra.gmra.mrb[0].mxu0 %vm585_vm9, %v208_v23  ;;  %2366 = vmatmul.mubr.msk.f32.vlgmr.msra.gmra.mrb[0].mxu1 %vm585_vm9, %v208_v23 }
  0xc8   : > { %769 = vmatprep.mubr.f32.mxu1 %v4254_v4  ;;  %680 = vmatprep.mubr.f32.mxu0 %v4254_v4 }
  0xcb   : > { %2367 = vmatmul.mubr.msk.f32.gmra.mrb[2].mxu1 %vm585_vm9, %v209_v24  ;;  %2361 = vmatmul.mubr.msk.f32.gmra.mrb[2].mxu0 %vm585_vm9, %v209_v24 }
  0xcc   : > { %686 = vmatprep.mubr.f32.mxu0 %v4254_v4  ;;  %775 = vmatprep.mubr.f32.mxu1 %v4254_v4 }
  0xd2   : > { %v568_v31 = vpop.permute.xlu0 %567  ;;  %v573_v58 = vpop.permute.xlu1 %572 }
 0x19a   : > { %v676_v13 = vpop.f32.mrb[0].mxu0  ;;  %v765_v45 = vpop.f32.mrb[0].mxu1 }
 0x19b   : > { %v678_v46 = vpop.f32.mrb[1].mxu0  ;;  %v767_v50 = vpop.f32.mrb[1].mxu1  ;;  %v3015_v51 = vadd.f32 %v765_v45, %v568_v31  ;;  %v3017_v52 = vadd.f32 %v676_v13, %v568_v31 }
 0x19c   : > { %v3019_v53 = vadd.f32 %v678_v46, %v568_v31  ;;  %v3021_v55 = vadd.f32 %v767_v50, %v568_v31 }
 0x19d   : > { %v797_v5 = vmul.f32 %v3017_v52, %v3017_v52  ;;  %v861_v42 = vmul.f32 %v3015_v51, %v3015_v51 }
 0x19e   : > { %v771_v59 = vpop.f32.mrb[2].mxu1  ;;  %v682_v60 = vpop.f32.mrb[2].mxu0  ;;  %v853_v62 = vadd.f32 %v3021_v55, %v3015_v51  ;;  %v788_v63 = vadd.f32 %v3019_v53, %v3017_v52  ;;  %v798_v3 = vmul.f32 %v3019_v53, %v3019_v53  ;;  %v862_v44 = vmul.f32 %v3021_v55, %v3021_v55 }
 0x19f   : > { %v773_v6 = vpop.f32.mrb[3].mxu1  ;;  %v3031_v2 = vadd.f32 %v682_v60, %v573_v58  ;;  %v684_v7 = vpop.f32.mrb[3].mxu0  ;;  %v3033_v9 = vadd.f32 %v771_v59, %v573_v58 }
 0x1a0   : > { %v3035_v0 = vadd.f32 %v773_v6, %v573_v58  ;;  %854 = vadd.xlane.f32.xlu0 %v853_v62  ;;  %789 = vadd.xlane.f32.xlu1 %v788_v63  ;;  %v3037_v10 = vadd.f32 %v684_v7, %v573_v58  ;;  %v801_v14 = vadd.f32 %v798_v3, %v797_v5 }
 0x1a1   : > { %v799_v12 = vmul.f32 %v3031_v2, %v3031_v2  ;;  %v863_v22 = vmul.f32 %v3033_v9, %v3033_v9  ;;  %v865_v24 = vadd.f32 %v862_v44, %v861_v42 }
 0x1a2   : > { %v856_v15 = vadd.f32 %v3035_v0, %v3033_v9  ;;  %v800_v32 = vmul.f32 %v3037_v10, %v3037_v10  ;;  %v791_v37 = vadd.f32 %v3037_v10, %v3031_v2  ;;  %v864_v23 = vmul.f32 %v3035_v0, %v3035_v0 }
 0x1a4   : > { %802 = vadd.xlane.f32.xlu0 %v801_v14  ;;  %857 = vadd.xlane.f32.xlu1 %v856_v15  ;;  %v804_v30 = vadd.f32 %v800_v32, %v799_v12  ;;  %v868_v31 = vadd.f32 %v864_v23, %v863_v22 }
 0x1a8   : > { %792 = vadd.xlane.f32.xlu0 %v791_v37  ;;  %805 = vadd.xlane.f32.xlu1 %v804_v30 }
 0x1ac   : > { %866 = vadd.xlane.f32.xlu0 %v865_v24  ;;  %869 = vadd.xlane.f32.xlu1 %v868_v31 }
 0x22d   : > { %v855_v13 = vpop.xlane.xlu0 %854  ;;  %v790_v45 = vpop.xlane.xlu1 %789 }
 0x22e   : > { %v795_v46 = vmul.f32 0.00390625, %v790_v45  ;;  %v859_v63 = vmul.f32 0.00390625, %v855_v13 }
 0x230   : > { %v809_v59 = vmul.f32 %v795_v46, %v795_v46  ;;  %v873_v32 = vmul.f32 %v859_v63, %v859_v63 }
 0x231   : > { %v803_v50 = vpop.xlane.xlu0 %802  ;;  %v858_v58 = vpop.xlane.xlu1 %857 }
 0x232   : > { %v807_v60 = vmul.f32 0.00390625, %v803_v50  ;;  %v860_v7 = vmul.f32 0.00390625, %v858_v58  ;;  %v222_v58 = vld [vmem:[%s4252_s3 + $0x30] sm:$0xff] }
 0x234   : > { %v811_v62 = vsub.f32 %v807_v60, %v809_v59  ;;  %v874_v42 = vmul.f32 %v860_v7, %v860_v7  ;;  %v226_v60 = vld [vmem:[%s4252_s3 + $0x50] sm:$0xff] }
 0x235   : > { %v793_v5 = vpop.xlane.xlu0 %792  ;;  %v806_v3 = vpop.xlane.xlu1 %805 }
 0x236   : > { %v813_v6 = vadd.f32 1e-05, %v811_v62  ;;  %v796_v12 = vmul.f32 0.00390625, %v793_v5  ;;  %v808_v14 = vmul.f32 0.00390625, %v806_v3  ;;  %v223_v3 = vld [vmem:[%s4252_s3 + $0x38] sm:$0xff] }
 0x238   : > { %2584 = vrsqrt.f32 %v813_v6  ;;  %v810_v15 = vmul.f32 %v796_v12, %v796_v12 }
 0x239   : > { %v867_v37 = vpop.xlane.xlu0 %866  ;;  %v870_v30 = vpop.xlane.xlu1 %869 }
 0x23a   : > { %v812_v44 = vsub.f32 %v808_v14, %v810_v15  ;;  %v871_v22 = vmul.f32 0.00390625, %v867_v37  ;;  %v872_v23 = vmul.f32 0.00390625, %v870_v30 }
 0x23c   : > { %v814_v24 = vadd.f32 1e-05, %v812_v44  ;;  %v875_v31 = vsub.f32 %v871_v22, %v873_v32  ;;  %v876_v45 = vsub.f32 %v872_v23, %v874_v42  ;;  %v227_v44 = vld [vmem:[%s4252_s3 + $0x58] sm:$0xff] }
 0x23e   : > { %2586 = vrsqrt.f32 %v814_v24  ;;  %v877_v13 = vadd.f32 1e-05, %v875_v31  ;;  %v878_v50 = vadd.f32 1e-05, %v876_v45  ;;  %v224_v24 = vld [vmem:[%s4252_s3 + $0x40] sm:$0xff]  ;;  %v225_v45 = vld [vmem:[%s4252_s3 + $0x48] sm:$0xff] }
 0x240   : > { %2588 = vrsqrt.f32 %v877_v13 }
 0x241   : > { %2590 = vrsqrt.f32 %v878_v50 }
 0x242   : > { %v2585_v59 = vpop.eup %2584 }
 0x243   : > { %v817_v62 = vmul.f32 %v2585_v59, %v222_v58 }
 0x245   : > { %v819_v5 = vadd.f32 %v817_v62, %v226_v60  ;;  %v821_v22 = vmul.f32 %v817_v62, %v795_v46 }
 0x247   : > { %827 = vperm.xlu0 %2580, %v819_v5   ;;  %v823_v13 = vsub.f32 %v224_v24, %v821_v22 }
 0x248   : > { %v2587_v6 = vpop.eup %2586 }
 0x249   : > { %v818_v15 = vmul.f32 %v2587_v6, %v223_v3 }
 0x24a   : > { %v2589_v14 = vpop.eup %2588 }
 0x24b   : > { %v2591_v32 = vpop.eup %2590  ;;  %v881_v37 = vmul.f32 %v2589_v14, %v222_v58  ;;  %v822_v31 = vmul.f32 %v818_v15, %v796_v12  ;;  %v820_v62 = vadd.f32 %v818_v15, %v227_v44  ;;  %v210_v12 = vld [vmem:[%s4251_s2 + $0x20] sm:$0xff] }
 0x24c   : > { %v882_v30 = vmul.f32 %v2591_v32, %v223_v3  ;;  %2362 = vmatmul.mubr.msk.f32.gmra.mrb[4].mxu0 %vm585_vm9, %v210_v12  ;;  %2368 = vmatmul.mubr.msk.f32.gmra.mrb[4].mxu1 %vm585_vm9, %v210_v12 }
 0x24d   : > { %v883_v42 = vadd.f32 %v881_v37, %v226_v60  ;;  %v885_v50 = vmul.f32 %v881_v37, %v859_v63  ;;  %v824_v58 = vsub.f32 %v225_v45, %v822_v31  ;;  %692 = vmatprep.mubr.f32.mxu0 %v4254_v4  ;;  %781 = vmatprep.mubr.f32.mxu1 %v4254_v4  ;;  %v211_v63 = vld [vmem:[%s4251_s2 + $0x30] sm:$0xff] }
 0x24e   : > { %v884_v23 = vadd.f32 %v882_v30, %v227_v44  ;;  %v886_v59 = vmul.f32 %v882_v30, %v860_v7 }
 0x24f   : > { %891 = vperm.xlu1 %2581, %v883_v42   ;;  %v887_v60 = vsub.f32 %v224_v24, %v885_v50 }
 0x250   : > { %896 = vperm.xlu0 %2580, %v884_v23   ;;  %v888_v46 = vsub.f32 %v225_v45, %v886_v59  ;;  %2363 = vmatmul.mubr.msk.f32.gmra.mrb[6].mxu0 %vm585_vm9, %v211_v63 }
 0x251   : > { %2369 = vmatmul.mubr.msk.f32.gmra.mrb[6].mxu1 %vm585_vm9, %v211_v63 }
 0x253   : > { %841 = vperm.xlu1 %2581, %v823_v13  }
 0x254   : > { %846 = vperm.xlu0 %2580, %v824_v58  }
 0x257   : > { %905 = vperm.xlu1 %2581, %v887_v60  }
 0x258   : > { %910 = vperm.xlu0 %2580, %v888_v46  }
 0x25b   : > { %832 = vperm.xlu1 %2581, %v820_v62  }
 0x2c6   : > { %v828_v7 = vpop.permute.xlu0 %827 }
 0x2c7   : > { %v835_v3 = vmul.f32 %v828_v7, %v3017_v52  ;;  %v836_v6 = vmul.f32 %v828_v7, %v3019_v53 }
 0x2ce   : > { %v892_v5 = vpop.permute.xlu1 %891 }
 0x2cf   : > { %v897_v14 = vpop.permute.xlu0 %896  ;;  %v899_v30 = vmul.f32 %v892_v5, %v3015_v51  ;;  %v900_v45 = vmul.f32 %v892_v5, %v3021_v55 }
 0x2d0   : > { %v901_v55 = vmul.f32 %v897_v14, %v3033_v9 }
 0x2d2   : > { %v842_v15 = vpop.permute.xlu1 %841 }
 0x2d3   : > { %v849_v32 = vadd.f32 %v842_v15, %v835_v3  ;;  %v850_v37 = vadd.f32 %v842_v15, %v836_v6  ;;  %v847_v31 = vpop.permute.xlu0 %846 }
 0x2d5   : > { %v917_v42 = vmul.f32 0.1, %v849_v32  ;;  %v918_v44 = vmul.f32 0.1, %v850_v37 }
 0x2d6   : > { %v906_v22 = vpop.permute.xlu1 %905 }
 0x2d7   : > { %v3088_v23 = vmax.f32 %v849_v32, %v917_v42  ;;  %v913_v24 = vadd.f32 %v906_v22, %v899_v30  ;;  %v3093_v52 = vmax.f32 %v850_v37, %v918_v44  ;;  %v914_v13 = vadd.f32 %v906_v22, %v900_v45  ;;  %v911_v46 = vpop.permute.xlu0 %910  ;;  %v213_v22 = vld [vmem:[%s4251_s2 + $0x48] sm:$0xff] }
 0x2d8   : > { %v915_v7 = vadd.f32 %v911_v46, %v901_v55  ;;  %2370 = vmatprep.mubr.msk.f32.mxu0 %vm1199_vm10, %v213_v22  ;;  %2372 = vmatprep.mubr.msk.f32.mxu1 %vm1199_vm10, %v213_v22 }
 0x2d9   : > { %933 = vrot.lane.b32.xlu1 %v3088_v23, %s2614_s23  ;;  %v919_v50 = vmul.f32 0.1, %v913_v24  ;;  %v920_v62 = vmul.f32 0.1, %v914_v13 }
 0x2da   : > { %v833_v53 = vpop.permute.xlu1 %832  ;;  %v923_v9 = vmul.f32 0.1, %v915_v7 }
 0x2db   : > { %v837_v58 = vmul.f32 %v833_v53, %v3031_v2  ;;  %v838_v51 = vmul.f32 %v833_v53, %v3037_v10  ;;  %v3100_v12 = vmax.f32 %v913_v24, %v919_v50  ;;  %v902_v2 = vmul.f32 %v897_v14, %v3035_v0  ;;  %v220_v24 = vld [vmem:[%s4252_s3 + $0x20] sm:$0xff]  ;;  %v218_v50 = vld [vmem:[%s4252_s3 + $0x10] sm:$0xff] }
 0x2dc   : > { %v3107_v10 = vmax.f32 %v914_v13, %v920_v62  ;;  %v3117_v37 = vmax.f32 %v915_v7, %v923_v9 }
 0x2dd   : > { %v851_v59 = vadd.f32 %v847_v31, %v837_v58  ;;  %v852_v60 = vadd.f32 %v847_v31, %v838_v51  ;;  %937 = vrot.lane.b32.xlu1 %v3093_v52, %s2614_s23  ;;  %v916_v6 = vadd.f32 %v911_v46, %v902_v2 }
 0x2df   : > { %v921_v63 = vmul.f32 0.1, %v851_v59  ;;  %v922_v5 = vmul.f32 0.1, %v852_v60  ;;  %v924_v32 = vmul.f32 0.1, %v916_v6 }
 0x2e1   : > { %v3102_v3 = vmax.f32 %v851_v59, %v921_v63  ;;  %941 = vrot.lane.b32.xlu1 %v3100_v12, %s2614_s23  ;;  %v3111_v15 = vmax.f32 %v852_v60, %v922_v5  ;;  %v3123_v0 = vmax.f32 %v916_v6, %v924_v32  ;;  %v221_v32 = vld [vmem:[%s4252_s3 + $0x28] sm:$0xff] }
 0x2e3   : > { %935 = vrot.lane.b32.xlu0 %v3102_v3, %s2614_s23 }
 0x2e5   : > { %945 = vrot.lane.b32.xlu1 %v3107_v10, %s2614_s23 }
 0x2e7   : > { %939 = vrot.lane.b32.xlu0 %v3111_v15, %s2614_s23 }
 0x2e9   : > { %965 = vrot.lane.b32.xlu1 %v3088_v23, %s2612_s21 }
 0x2eb   : > { %943 = vrot.lane.b32.xlu0 %v3117_v37, %s2614_s23 }
 0x2ed   : > { %969 = vrot.lane.b32.xlu1 %v3093_v52, %s2612_s21 }
 0x2ef   : > { %947 = vrot.lane.b32.xlu0 %v3123_v0, %s2614_s23 }
 0x2f1   : > { %973 = vrot.lane.b32.xlu1 %v3100_v12, %s2612_s21 }
 0x2f3   : > { %967 = vrot.lane.b32.xlu0 %v3102_v3, %s2612_s21 }
 0x2f5   : > { %977 = vrot.lane.b32.xlu1 %v3107_v10, %s2612_s21 }
 0x2f7   : > { %971 = vrot.lane.b32.xlu0 %v3111_v15, %s2612_s21 }
 0x2f9   : > { %997 = vrot.lane.b32.xlu1 %v3088_v23, %s2615_s24 }
 0x2fb   : > { %975 = vrot.lane.b32.xlu0 %v3117_v37, %s2612_s21 }
 0x2fd   : > { %1001 = vrot.lane.b32.xlu1 %v3093_v52, %s2615_s24 }
 0x2ff   : > { %979 = vrot.lane.b32.xlu0 %v3123_v0, %s2612_s21 }
 0x301   : > { %1005 = vrot.lane.b32.xlu1 %v3100_v12, %s2615_s24 }
 0x303   : > { %999 = vrot.lane.b32.xlu0 %v3102_v3, %s2615_s24 }
 0x305   : > { %1009 = vrot.lane.b32.xlu1 %v3107_v10, %s2615_s24 }
 0x307   : > { %1003 = vrot.lane.b32.xlu0 %v3111_v15, %s2615_s24 }
 0x309   : > { %1029 = vrot.lane.b32.xlu1 %v3088_v23, %s2613_s22 }
 0x30b   : > { %1007 = vrot.lane.b32.xlu0 %v3117_v37, %s2615_s24 }
 0x30d   : > { %1033 = vrot.lane.b32.xlu1 %v3093_v52, %s2613_s22 }
 0x30f   : > { %1011 = vrot.lane.b32.xlu0 %v3123_v0, %s2615_s24 }
 0x311   : > { %1037 = vrot.lane.b32.xlu1 %v3100_v12, %s2613_s22 }
 0x313   : > { %1031 = vrot.lane.b32.xlu0 %v3102_v3, %s2613_s22 }
 0x315   : > { %1041 = vrot.lane.b32.xlu1 %v3107_v10, %s2613_s22 }
 0x317   : > { %1035 = vrot.lane.b32.xlu0 %v3111_v15, %s2613_s22 }
 0x319   : > { %1061 = vrot.lane.b32.xlu1 %v3088_v23, %s2616_s25 }
 0x31b   : > { %1039 = vrot.lane.b32.xlu0 %v3117_v37, %s2613_s22 }
 0x31d   : > { %1065 = vrot.lane.b32.xlu1 %v3093_v52, %s2616_s25 }
 0x31f   : > { %1043 = vrot.lane.b32.xlu0 %v3123_v0, %s2613_s22  ;;  %v3252_v60 = vpop.f32.mrb[4].mxu0  ;;  %v3254_v46 = vpop.f32.mrb[4].mxu1 }
 0x320   : > { %v3256_v55 = vpop.f32.mrb[5].mxu0  ;;  %v3258_v7 = vpop.f32.mrb[5].mxu1 }
 0x321   : > { %1069 = vrot.lane.b32.xlu1 %v3100_v12, %s2616_s25 }
 0x323   : > { %1063 = vrot.lane.b32.xlu0 %v3102_v3, %s2616_s25 }
 0x325   : > { %1073 = vrot.lane.b32.xlu1 %v3107_v10, %s2616_s25 }
 0x327   : > { %1067 = vrot.lane.b32.xlu0 %v3111_v15, %s2616_s25 }
 0x329   : > { %1093 = vrot.lane.b32.xlu1 %v3088_v23, %s2618_s27 }
 0x32b   : > { %1071 = vrot.lane.b32.xlu0 %v3117_v37, %s2616_s25 }
 0x32d   : > { %1097 = vrot.lane.b32.xlu1 %v3093_v52, %s2618_s27 }
 0x32f   : > { %1075 = vrot.lane.b32.xlu0 %v3123_v0, %s2616_s25 }
 0x331   : > { %1101 = vrot.lane.b32.xlu1 %v3100_v12, %s2618_s27 }
 0x333   : > { %1095 = vrot.lane.b32.xlu0 %v3102_v3, %s2618_s27 }
 0x335   : > { %1105 = vrot.lane.b32.xlu1 %v3107_v10, %s2618_s27 }
 0x337   : > { %1099 = vrot.lane.b32.xlu0 %v3111_v15, %s2618_s27 }
 0x339   : > { %1125 = vrot.lane.b32.xlu1 %v3088_v23, %s2617_s26 }
 0x33b   : > { %1103 = vrot.lane.b32.xlu0 %v3117_v37, %s2618_s27 }
 0x33d   : > { %1129 = vrot.lane.b32.xlu1 %v3093_v52, %s2617_s26 }
 0x33f   : > { %1107 = vrot.lane.b32.xlu0 %v3123_v0, %s2618_s27 }
 0x341   : > { %1133 = vrot.lane.b32.xlu1 %v3100_v12, %s2617_s26 }
 0x343   : > { %1127 = vrot.lane.b32.xlu0 %v3102_v3, %s2617_s26 }
 0x345   : > { %1137 = vrot.lane.b32.xlu1 %v3107_v10, %s2617_s26 }
 0x347   : > { %1131 = vrot.lane.b32.xlu0 %v3111_v15, %s2617_s26 }
 0x349   : > { %1157 = vrot.lane.b32.xlu1 %v3088_v23, %s2620_s28 }
 0x34b   : > { %1135 = vrot.lane.b32.xlu0 %v3117_v37, %s2617_s26  ;;  %v934_v14 = vpop.permute.xlu1 %933 }
 0x34d   : > { %1161 = vrot.lane.b32.xlu1 %v3093_v52, %s2620_s28 }
 0x34f   : > { %1139 = vrot.lane.b32.xlu0 %v3123_v0, %s2617_s26  ;;  %v938_v30 = vpop.permute.xlu1 %937 }
 0x350   : > { %v953_v45 = vsel %vm244_vm0, %v934_v14, %v938_v30 }
 0x351   : > { %1165 = vrot.lane.b32.xlu1 %v3100_v12, %s2620_s28  ;;  %v958_v58 = vmul.f32 %v953_v45, %v2808_v39 }
 0x353   : > { %1159 = vrot.lane.b32.xlu0 %v3102_v3, %s2620_s28  ;;  %v942_v42 = vpop.permute.xlu1 %941 }
 0x355   : > { %1169 = vrot.lane.b32.xlu1 %v3107_v10, %s2620_s28  ;;  %v936_v44 = vpop.permute.xlu0 %935 }
 0x357   : > { %1163 = vrot.lane.b32.xlu0 %v3111_v15, %s2620_s28  ;;  %v946_v31 = vpop.permute.xlu1 %945 }
 0x358   : > { %v955_v5 = vsel %vm244_vm0, %v946_v31, %v934_v14  ;;  %v949_v6 = vsel %vm244_vm0, %v942_v42, %v946_v31 }
 0x359   : > { %1191 = vperm.xlu1 %2581, %v220_v24   ;;  %v940_v53 = vpop.permute.xlu0 %939  ;;  %v951_v24 = vsel %vm244_vm0, %v938_v30, %v942_v42  ;;  %v957_v14 = vmul.f32 %v955_v5, %v2811_v40  ;;  %v960_v31 = vmul.f32 %v949_v6, %v2825_v47  ;;  %v219_v30 = vld [vmem:[%s4252_s3 + $0x18] sm:$0xff]  ;;  %v3288_v6 = vpop.f32.mrb[6].mxu1 }
 0x35a   : > { %v954_v13 = vsel %vm244_vm0, %v936_v44, %v940_v53  ;;  %v959_v42 = vmul.f32 %v951_v24, %v2818_v43 }
 0x35b   : > { %v962_v51 = vmul.f32 %v954_v13, %v2808_v39  ;;  %1167 = vrot.lane.b32.xlu0 %v3117_v37, %s2620_s28  ;;  %v966_v59 = vpop.permute.xlu1 %965 }
 0x35d   : > { %577 = vperm.xlu1 %2581, %v218_v50   ;;  %v944_v62 = vpop.permute.xlu0 %943  ;;  %v2402_v63 = vpack.c.bf16 %v962_v51, %v958_v58 }
 0x35e   : > { %v952_v9 = vsel %vm244_vm0, %v940_v53, %v944_v62 }
 0x35f   : > { %1171 = vrot.lane.b32.xlu0 %v3123_v0, %s2620_s28  ;;  %2403 = vmatprep.subr.bf16.mxu0 %v2402_v63  ;;  %v970_v2 = vpop.permute.xlu1 %969  ;;  %v963_v53 = vmul.f32 %v952_v9, %v2818_v43 }
 0x361   : > { %v948_v22 = vpop.permute.xlu0 %947 }
 0x362   : > { %v950_v45 = vsel %vm244_vm0, %v944_v62, %v948_v22  ;;  %v956_v13 = vsel %vm244_vm0, %v948_v22, %v936_v44  ;;  %v3286_v44 = vpop.f32.mrb[6].mxu0  ;;  %v2440_v22 = vpack.c.bf16 %v963_v53, %v959_v42 }
 0x363   : > { %v961_v50 = vmul.f32 %v956_v13, %v2811_v40  ;;  %v964_v58 = vmul.f32 %v950_v45, %v2825_v47  ;;  %1196 = vperm.xlu0 %2580, %v221_v32   ;;  %v974_v51 = vpop.permute.xlu1 %973  ;;  %v3290_v9 = vpop.f32.mrb[7].mxu0  ;;  %v985_v13 = vsel %vm277_vm1, %v966_v59, %v970_v2 }
 0x364   : > { %v3292_v45 = vpop.f32.mrb[7].mxu1  ;;  %v983_v4 = vsel %vm277_vm1, %v970_v2, %v974_v51 }
 0x365   : > { %v2404_v62 = vpack.c.bf16 %v961_v50, %v957_v14  ;;  %v968_v63 = vpop.permute.xlu0 %967  ;;  %v2438_v5 = vpack.c.bf16 %v964_v58, %v960_v31  ;;  %v990_v31 = vmul.f32 %v985_v13, %v2788_v29  ;;  %v991_v2 = vmul.f32 %v983_v4, %v2792_v33 }
 0x367   : > { %582 = vperm.xlu0 %2580, %v219_v30   ;;  %2405 = vmatpush1.bf16.msra.mxu0 %v2404_v62  ;;  %v978_v32 = vpop.permute.xlu1 %977 }
 0x368   : > { %2439 = vmatprep.subr.bf16.mxu1 %v2438_v5  ;;  %v981_v5 = vsel %vm277_vm1, %v974_v51, %v978_v32 }
 0x369   : > { %2441 = vmatpush1.bf16.msra.mxu1 %v2440_v22  ;;  %v972_v24 = vpop.permute.xlu0 %971  ;;  %v987_v22 = vsel %vm277_vm1, %v978_v32, %v966_v59 }
 0x36a   : > { %v986_v14 = vsel %vm277_vm1, %v968_v63, %v972_v24 }
 0x36b   : > { %v994_v50 = vmul.f32 %v986_v14, %v2788_v29  ;;  %v998_v58 = vpop.permute.xlu1 %997 }
 0x36d   : > { %v976_v53 = vpop.permute.xlu0 %975  ;;  %v2406_v30 = vpack.c.bf16 %v994_v50, %v990_v31  ;;  %v989_v50 = vmul.f32 %v987_v22, %v2777_v26 }
 0x36e   : > { %v984_v42 = vsel %vm277_vm1, %v972_v24, %v976_v53 }
 0x36f   : > { %2407 = vmatprep.subr.bf16.mxu0 %v2406_v30  ;;  %v1002_v62 = vpop.permute.xlu1 %1001  ;;  %v995_v14 = vmul.f32 %v984_v42, %v2792_v33  ;;  %v992_v30 = vmul.f32 %v981_v5, %v2782_v27 }
 0x371   : > { %v980_v13 = vpop.permute.xlu0 %979  ;;  %v2444_v40 = vpack.c.bf16 %v995_v14, %v991_v2 }
 0x372   : > { %v982_v31 = vsel %vm277_vm1, %v976_v53, %v980_v13  ;;  %v988_v24 = vsel %vm277_vm1, %v980_v13, %v968_v63  ;;  %v1017_v63 = vsel %vm310_vm2, %v998_v58, %v1002_v62 }
 0x373   : > { %v993_v29 = vmul.f32 %v988_v24, %v2777_v26  ;;  %v996_v59 = vmul.f32 %v982_v31, %v2782_v27  ;;  %v1006_v32 = vpop.permute.xlu1 %1005  ;;  %v1022_v13 = vmul.f32 %v1017_v63, %v2828_v49 }
 0x375   : > { %v2408_v51 = vpack.c.bf16 %v993_v29, %v989_v50  ;;  %v1000_v47 = vpop.permute.xlu0 %999  ;;  %v2442_v42 = vpack.c.bf16 %v996_v59, %v992_v30  ;;  %v1015_v59 = vsel %vm310_vm2, %v1002_v62, %v1006_v32 }
 0x376   : > { %v1023_v62 = vmul.f32 %v1015_v59, %v2842_v57 }
 0x377   : > { %2409 = vmatpush1.bf16.msra.mxu0 %v2408_v51  ;;  %2443 = vmatprep.subr.bf16.mxu1 %v2442_v42  ;;  %v1010_v53 = vpop.permute.xlu1 %1009 }
 0x378   : > { %2445 = vmatpush1.bf16.msra.mxu1 %v2444_v40  ;;  %v1013_v30 = vsel %vm310_vm2, %v1006_v32, %v1010_v53  ;;  %v1019_v40 = vsel %vm310_vm2, %v1010_v53, %v998_v58 }
 0x379   : > { %v1004_v22 = vpop.permute.xlu0 %1003 }
 0x37a   : > { %v1018_v5 = vsel %vm310_vm2, %v1000_v47, %v1004_v22 }
 0x37b   : > { %v1026_v31 = vmul.f32 %v1018_v5, %v2828_v49  ;;  %v1030_v4 = vpop.permute.xlu1 %1029  ;;  %v1024_v5 = vmul.f32 %v1013_v30, %v2849_v61 }
 0x37d   : > { %v1008_v29 = vpop.permute.xlu0 %1007  ;;  %v2410_v24 = vpack.c.bf16 %v1026_v31, %v1022_v13 }
 0x37e   : > { %v1016_v14 = vsel %vm310_vm2, %v1004_v22, %v1008_v29  ;;  %v1021_v22 = vmul.f32 %v1019_v40, %v2839_v56 }
 0x37f   : > { %2411 = vmatprep.subr.bf16.mxu0 %v2410_v24  ;;  %v1034_v50 = vpop.permute.xlu1 %1033  ;;  %v1027_v51 = vmul.f32 %v1016_v14, %v2842_v57 }
 0x381   : > { %v1012_v2 = vpop.permute.xlu0 %1011  ;;  %v2448_v14 = vpack.c.bf16 %v1027_v51, %v1023_v62 }
 0x382   : > { %v1014_v42 = vsel %vm310_vm2, %v1008_v29, %v1012_v2  ;;  %v1020_v63 = vsel %vm310_vm2, %v1012_v2, %v1000_v47  ;;  %v1049_v47 = vsel %vm343_vm3, %v1030_v4, %v1034_v50 }
 0x383   : > { %v1025_v13 = vmul.f32 %v1020_v63, %v2839_v56  ;;  %v1028_v58 = vmul.f32 %v1014_v42, %v2849_v61  ;;  %v1038_v53 = vpop.permute.xlu1 %1037  ;;  %v1054_v2 = vmul.f32 %v1049_v47, %v2785_v28 }
 0x384   : > { %v1047_v62 = vsel %vm343_vm3, %v1034_v50, %v1038_v53 }
 0x385   : > { %v2412_v32 = vpack.c.bf16 %v1025_v13, %v1021_v22  ;;  %v1032_v31 = vpop.permute.xlu0 %1031  ;;  %v2446_v24 = vpack.c.bf16 %v1028_v58, %v1024_v5  ;;  %v1055_v50 = vmul.f32 %v1047_v62, %v2798_v35  ;;  %v2420_v62 = vpack.c.bf16 %v3102_v3, %v3088_v23 }
 0x387   : > { %2413 = vmatpush1.bf16.msra.mxu0 %v2412_v32  ;;  %2447 = vmatprep.subr.bf16.mxu1 %v2446_v24  ;;  %v1042_v29 = vpop.permute.xlu1 %1041 }
 0x388   : > { %2449 = vmatpush1.bf16.msra.mxu1 %v2448_v14  ;;  %v1045_v13 = vsel %vm343_vm3, %v1038_v53, %v1042_v29  ;;  %v1051_v58 = vsel %vm343_vm3, %v1042_v29, %v1030_v4 }
 0x389   : > { %v1036_v40 = vpop.permute.xlu0 %1035 }
 0x38a   : > { %v1050_v30 = vsel %vm343_vm3, %v1032_v31, %v1036_v40 }
 0x38b   : > { %v1058_v42 = vmul.f32 %v1050_v30, %v2785_v28  ;;  %v1062_v59 = vpop.permute.xlu1 %1061  ;;  %v1056_v30 = vmul.f32 %v1045_v13, %v2801_v36  ;;  %v2454_v13 = vpack.c.bf16 %v3123_v0, %v3107_v10 }
 0x38d   : > { %v1040_v63 = vpop.permute.xlu0 %1039  ;;  %v2414_v22 = vpack.c.bf16 %v1058_v42, %v1054_v2 }
 0x38e   : > { %v1048_v51 = vsel %vm343_vm3, %v1036_v40, %v1040_v63  ;;  %v1053_v40 = vmul.f32 %v1051_v58, %v2795_v34 }
 0x38f   : > { %2415 = vmatprep.subr.bf16.mxu0 %v2414_v22  ;;  %v1066_v5 = vpop.permute.xlu1 %1065  ;;  %v1059_v24 = vmul.f32 %v1048_v51, %v2798_v35 }
 0x390   : > { %v1081_v10 = vsel %vm376_vm5, %v1062_v59, %v1066_v5 }
 0x391   : > { %v1044_v32 = vpop.permute.xlu0 %1043  ;;  %v2452_v51 = vpack.c.bf16 %v1059_v24, %v1055_v50 }
 0x392   : > { %v1046_v14 = vsel %vm343_vm3, %v1040_v63, %v1044_v32  ;;  %v1052_v47 = vsel %vm343_vm3, %v1044_v32, %v1032_v31  ;;  %v2418_v63 = vpack.c.bf16 %v3111_v15, %v3093_v52  ;;  %v2456_v32 = vpack.c.bf16 %v3117_v37, %v3100_v12 }
 0x393   : > { %v1057_v2 = vmul.f32 %v1052_v47, %v2795_v34  ;;  %v1060_v4 = vmul.f32 %v1046_v14, %v2801_v36  ;;  %v1070_v29 = vpop.permute.xlu1 %1069  ;;  %v1085_v47 = vmul.f32 %v1081_v10, %v2888_v17 }
 0x394   : > { %v1079_v15 = vsel %vm376_vm5, %v1066_v5, %v1070_v29 }
 0x395   : > { %v2416_v53 = vpack.c.bf16 %v1057_v2, %v1053_v40  ;;  %v1064_v42 = vpop.permute.xlu0 %1063  ;;  %v2450_v22 = vpack.c.bf16 %v1060_v4, %v1056_v30  ;;  %v1086_v12 = vmul.f32 %v1079_v15, %v2894_v20 }
 0x397   : > { %2417 = vmatpush1.bf16.msra.mxu0 %v2416_v53  ;;  %2451 = vmatprep.subr.bf16.mxu1 %v2450_v22  ;;  %v1074_v31 = vpop.permute.xlu1 %1073 }
 0x398   : > { %2419 = vmatprep.subr.bf16.mxu0 %v2418_v63  ;;  %2453 = vmatpush1.bf16.msra.mxu1 %v2452_v51  ;;  %v1077_v40 = vsel %vm376_vm5, %v1070_v29, %v1074_v31  ;;  %v1083_v30 = vsel %vm376_vm5, %v1074_v31, %v1062_v59 }
 0x399   : > { %v1068_v58 = vpop.permute.xlu0 %1067  ;;  %2455 = vmatprep.subr.bf16.mxu1 %v2454_v13  ;;  %v1087_v22 = vmul.f32 %v1077_v40, %v2897_v21  ;;  %v1088_v51 = vmul.f32 %v1083_v30, %v2891_v19 }
 0x39a   : > { %v1082_v24 = vsel %vm376_vm5, %v1064_v42, %v1068_v58 }
 0x39b   : > { %2421 = vmatpush1.bf16.msra.mxu0 %v2420_v62  ;;  %v1094_v52 = vpop.permute.xlu1 %1093  ;;  %v1089_v14 = vmul.f32 %v1082_v24, %v2888_v17 }
 0x39c   : > { %2457 = vmatpush1.bf16.msra.mxu1 %v2456_v32 }
 0x39d   : > { %v1072_v0 = vpop.permute.xlu0 %1071  ;;  %v2424_v4 = vpack.c.bf16 %v1089_v14, %v1085_v47 }
 0x39e   : > { %v1080_v23 = vsel %vm376_vm5, %v1068_v58, %v1072_v0 }
 0x39f   : > { %v1090_v3 = vmul.f32 %v1080_v23, %v2894_v20  ;;  %v1098_v37 = vpop.permute.xlu1 %1097 }
 0x3a0   : > { %v1113_v10 = vsel %vm409_vm7, %v1094_v52, %v1098_v37 }
 0x3a1   : > { %v1076_v5 = vpop.permute.xlu0 %1075  ;;  %v2422_v2 = vpack.c.bf16 %v1090_v3, %v1086_v12  ;;  %v1117_v40 = vmul.f32 %v1113_v10, %v2932_v54 }
 0x3a2   : > { %v1078_v50 = vsel %vm376_vm5, %v1072_v0, %v1076_v5  ;;  %v1084_v53 = vsel %vm376_vm5, %v1076_v5, %v1064_v42 }
 0x3a3   : > { %v1091_v63 = vmul.f32 %v1078_v50, %v2897_v21  ;;  %v1092_v29 = vmul.f32 %v1084_v53, %v2891_v19  ;;  %2423 = vmatprep.subr.bf16.mxu0 %v2422_v2  ;;  %v1102_v13 = vpop.permute.xlu1 %1101 }
 0x3a4   : > { %2425 = vmatpush1.bf16.msra.mxu0 %v2424_v4  ;;  %v1111_v15 = vsel %vm409_vm7, %v1098_v37, %v1102_v13 }
 0x3a5   : > { %v2460_v59 = vpack.c.bf16 %v1091_v63, %v1087_v22  ;;  %v1096_v31 = vpop.permute.xlu0 %1095  ;;  %v2458_v58 = vpack.c.bf16 %v1092_v29, %v1088_v51  ;;  %v1118_v12 = vmul.f32 %v1111_v15, %v2946_v8 }
 0x3a7   : > { %2459 = vmatprep.subr.bf16.mxu1 %v2458_v58  ;;  %v1106_v62 = vpop.permute.xlu1 %1105 }
 0x3a8   : > { %2461 = vmatpush1.bf16.msra.mxu1 %v2460_v59  ;;  %v1109_v30 = vsel %vm409_vm7, %v1102_v13, %v1106_v62  ;;  %v1115_v5 = vsel %vm409_vm7, %v1106_v62, %v1094_v52 }
 0x3a9   : > { %v1100_v32 = vpop.permute.xlu0 %1099  ;;  %v1119_v22 = vmul.f32 %v1109_v30, %v2949_v11  ;;  %v1120_v51 = vmul.f32 %v1115_v5, %v2943_v18 }
 0x3aa   : > { %v1114_v42 = vsel %vm409_vm7, %v1096_v31, %v1100_v32 }
 0x3ab   : > { %v1126_v24 = vpop.permute.xlu1 %1125  ;;  %v1121_v14 = vmul.f32 %v1114_v42, %v2932_v54 }
 0x3ad   : > { %v1104_v0 = vpop.permute.xlu0 %1103  ;;  %v2428_v4 = vpack.c.bf16 %v1121_v14, %v1117_v40 }
 0x3ae   : > { %v1112_v23 = vsel %vm409_vm7, %v1100_v32, %v1104_v0 }
 0x3af   : > { %v1122_v3 = vmul.f32 %v1112_v23, %v2946_v8  ;;  %v1130_v47 = vpop.permute.xlu1 %1129 }
 0x3b0   : > { %v1145_v10 = vsel %vm442_vm6, %v1126_v24, %v1130_v47 }
 0x3b1   : > { %v1108_v37 = vpop.permute.xlu0 %1107  ;;  %v2426_v2 = vpack.c.bf16 %v1122_v3, %v1118_v12  ;;  %v1149_v40 = vmul.f32 %v1145_v10, %v2900_v25 }
 0x3b2   : > { %v1110_v50 = vsel %vm409_vm7, %v1104_v0, %v1108_v37  ;;  %v1116_v53 = vsel %vm409_vm7, %v1108_v37, %v1096_v31 }
 0x3b3   : > { %v1123_v63 = vmul.f32 %v1110_v50, %v2949_v11  ;;  %v1124_v29 = vmul.f32 %v1116_v53, %v2943_v18  ;;  %2427 = vmatprep.subr.bf16.mxu0 %v2426_v2  ;;  %v1134_v13 = vpop.permute.xlu1 %1133 }
 0x3b4   : > { %2429 = vmatpush1.bf16.msra.mxu0 %v2428_v4  ;;  %v1143_v15 = vsel %vm442_vm6, %v1130_v47, %v1134_v13 }
 0x3b5   : > { %v2464_v52 = vpack.c.bf16 %v1123_v63, %v1119_v22  ;;  %v1128_v59 = vpop.permute.xlu0 %1127  ;;  %v2462_v58 = vpack.c.bf16 %v1124_v29, %v1120_v51  ;;  %v1150_v12 = vmul.f32 %v1143_v15, %v2911_v41 }
 0x3b7   : > { %2463 = vmatprep.subr.bf16.mxu1 %v2462_v58  ;;  %v1138_v62 = vpop.permute.xlu1 %1137 }
 0x3b8   : > { %2465 = vmatpush1.bf16.msra.mxu1 %v2464_v52  ;;  %v1141_v30 = vsel %vm442_vm6, %v1134_v13, %v1138_v62  ;;  %v1147_v5 = vsel %vm442_vm6, %v1138_v62, %v1126_v24 }
 0x3b9   : > { %v1132_v32 = vpop.permute.xlu0 %1131  ;;  %v1151_v22 = vmul.f32 %v1141_v30, %v2923_v48  ;;  %v1152_v51 = vmul.f32 %v1147_v5, %v2908_v38 }
 0x3ba   : > { %v1146_v31 = vsel %vm442_vm6, %v1128_v59, %v1132_v32 }
 0x3bb   : > { %v1158_v42 = vpop.permute.xlu1 %1157  ;;  %v1153_v14 = vmul.f32 %v1146_v31, %v2900_v25 }
 0x3bd   : > { %v1136_v0 = vpop.permute.xlu0 %1135  ;;  %v2432_v4 = vpack.c.bf16 %v1153_v14, %v1149_v40  ;;  %v3465_v40 = vld [vmem:[%s4250_s1 + $0x20] ss:$0 sm:$0xff] }
 0x3be   : > { %v1144_v23 = vsel %vm442_vm6, %v1132_v32, %v1136_v0  ;;  %4311 = vst [vmem:[#allocation15_spill] sm:$0xff] %v3465_v40 }
 0x3bf   : > { %v1154_v3 = vmul.f32 %v1144_v23, %v2911_v41  ;;  %v1162_v37 = vpop.permute.xlu1 %1161  ;;  %v3458_v23 = vld [vmem:[%s4250_s1 + $0x28] ss:$0 sm:$0xff] }
 0x3c0   : > { %v1177_v31 = vsel %vm475_vm8, %v1158_v42, %v1162_v37  ;;  %4310 = vst [vmem:[#allocation14_spill] sm:$0xff] %v3458_v23 }
 0x3c1   : > { %v1140_v47 = vpop.permute.xlu0 %1139  ;;  %v2430_v2 = vpack.c.bf16 %v1154_v3, %v1150_v12  ;;  %v1181_v30 = vmul.f32 %v3465_v40, %v1177_v31 }
 0x3c2   : > { %v1142_v50 = vsel %vm442_vm6, %v1136_v0, %v1140_v47  ;;  %v1148_v53 = vsel %vm442_vm6, %v1140_v47, %v1128_v59 }
 0x3c3   : > { %v1155_v63 = vmul.f32 %v1142_v50, %v2923_v48  ;;  %v1156_v29 = vmul.f32 %v1148_v53, %v2908_v38  ;;  %2431 = vmatprep.subr.bf16.mxu0 %v2430_v2  ;;  %v1166_v58 = vpop.permute.xlu1 %1165  ;;  %v3479_v53 = vld [vmem:[%s4250_s1 + $0x30] ss:$0 sm:$0xff] }
 0x3c4   : > { %2433 = vmatpush1.bf16.msra.mxu0 %v2432_v4  ;;  %v1175_v32 = vsel %vm475_vm8, %v1162_v37, %v1166_v58  ;;  %4312 = vst [vmem:[#allocation16_spill] sm:$0xff] %v3479_v53 }
 0x3c5   : > { %v2468_v24 = vpack.c.bf16 %v1155_v63, %v1151_v22  ;;  %v1160_v13 = vpop.permute.xlu0 %1159  ;;  %v2466_v52 = vpack.c.bf16 %v1156_v29, %v1152_v51  ;;  %v1182_v12 = vmul.f32 %v3458_v23, %v1175_v32 }
 0x3c7   : > { %2467 = vmatprep.subr.bf16.mxu1 %v2466_v52  ;;  %v1170_v15 = vpop.permute.xlu1 %1169 }
 0x3c8   : > { %2469 = vmatpush1.bf16.msra.mxu1 %v2468_v24  ;;  %v1179_v5 = vsel %vm475_vm8, %v1170_v15, %v1158_v42  ;;  %v3485_v42 = vld [vmem:[%s4250_s1 + $0x38] ss:$0 sm:$0xff]  ;;  %v212_v24 = vld [vmem:[%s4251_s2 + $0x40] sm:$0xff] }
 0x3c9   : > { %v1164_v62 = vpop.permute.xlu0 %1163  ;;  %4313 = vst [vmem:[#allocation17_spill] sm:$0xff] %v3485_v42  ;;  %v1184_v51 = vmul.f32 %v3485_v42, %v1179_v5 }
 0x3ca   : > { %v1178_v59 = vsel %vm475_vm8, %v1160_v13, %v1164_v62 }
 0x3cb   : > { %v1185_v0 = vmul.f32 %v2986_v1, %v1178_v59  ;;  %v1173_v1 = vsel %vm475_vm8, %v1166_v58, %v1170_v15  ;;  %v215_v58 = vld [vmem:[%s4251_s2 + $0x58] sm:$0xff] }
 0x3cc   : > { %v1183_v22 = vmul.f32 %v3479_v53, %v1173_v1 }
 0x3cd   : > { %v1168_v10 = vpop.permute.xlu0 %1167  ;;  %v2436_v2 = vpack.c.bf16 %v1185_v0, %v1181_v30 }
 0x3ce   : > { %v1176_v14 = vsel %vm475_vm8, %v1164_v62, %v1168_v10  ;;  %v214_v62 = vld [vmem:[%s4251_s2 + $0x50] sm:$0xff] }
 0x3cf   : > { %v1186_v3 = vmul.f32 %v3458_v23, %v1176_v14 }
 0x3d1   : > { %v1172_v37 = vpop.permute.xlu0 %1171  ;;  %v2434_v47 = vpack.c.bf16 %v1186_v3, %v1182_v12 }
 0x3d2   : > { %v1174_v4 = vsel %vm475_vm8, %v1168_v10, %v1172_v37  ;;  %v1180_v50 = vsel %vm475_vm8, %v1172_v37, %v1160_v13 }
 0x3d3   : > { %v1187_v63 = vmul.f32 %v3479_v53, %v1174_v4  ;;  %v1188_v29 = vmul.f32 %v3485_v42, %v1180_v50  ;;  %2435 = vmatprep.subr.bf16.mxu0 %v2434_v47 }
 0x3d4   : > { %2437 = vmatpush1.bf16.msra.mxu0 %v2436_v2 }
 0x3d5   : > { %v2472_v13 = vpack.c.bf16 %v1187_v63, %v1183_v22  ;;  %v2470_v52 = vpack.c.bf16 %v1188_v29, %v1184_v51 }
 0x3d7   : > { %1271 = vmatmul.mubr.f32.vlgmr.msra.gmra.mrb[8].mxu0 %v212_v24  ;;  %2471 = vmatprep.subr.bf16.mxu1 %v2470_v52 }
 0x3d8   : > { %2473 = vmatpush1.bf16.msra.mxu1 %v2472_v13  ;;  %2371 = vmatprep.mubr.msk.f32.mxu0 %vm1199_vm10, %v215_v58  ;;  %v1192_v59 = vpop.permute.xlu1 %1191 }
 0x3db   : > { %1277 = vmatmul.mubr.f32.gmra.mrb[10].mxu0 %v214_v62  ;;  %1348 = vmatmul.mubr.f32.vlgmr.msra.gmra.mrb[8].mxu1 %v212_v24 }
 0x3dc   : > { %2373 = vmatprep.mubr.msk.f32.mxu1 %vm1199_vm10, %v215_v58  ;;  %v578_v15 = vpop.permute.xlu1 %577 }
 0x3dd   : > { %v689_v30 = vadd.f32 %v3252_v60, %v578_v15  ;;  %v691_v2 = vadd.f32 %v3256_v55, %v578_v15  ;;  %v778_v29 = vadd.f32 %v3254_v46, %v578_v15  ;;  %v780_v60 = vadd.f32 %v3258_v7, %v578_v15 }
 0x3df   : > { %1354 = vmatmul.mubr.f32.gmra.mrb[10].mxu1 %v214_v62 }
 0x3e2   : > { %v1197_v32 = vpop.permute.xlu0 %1196 }
 0x3e6   : > { %v583_v12 = vpop.permute.xlu0 %582 }
 0x3e7   : > { %v697_v46 = vadd.f32 %v3290_v9, %v583_v12  ;;  %v786_v9 = vadd.f32 %v3292_v45, %v583_v12 }
 0x4aa   : > { %v1272_v31 = vpop.f32.mrb[8].mxu0 }
 0x4ab   : > { %v1273_v10 = vadd.f32 %v1272_v31, %v1192_v59  ;;  %v1274_v0 = vpop.f32.mrb[9].mxu0 }
 0x4ac   : > { %v1275_v14 = vadd.f32 %v1274_v0, %v1192_v59 }
 0x4ad   : > { %v1360_v3 = vmul.f32 0.1, %v1273_v10 }
 0x4ae   : > { %v1361_v1 = vmul.f32 0.1, %v1275_v14  ;;  %v1278_v5 = vpop.f32.mrb[10].mxu0  ;;  %v1349_v37 = vpop.f32.mrb[8].mxu1 }
 0x4af   : > { %v1368_v47 = vmax.f32 %v1273_v10, %v1360_v3  ;;  %v1279_v4 = vadd.f32 %v1278_v5, %v1197_v32  ;;  %v1350_v50 = vadd.f32 %v1349_v37, %v1192_v59  ;;  %v1280_v22 = vpop.f32.mrb[11].mxu0  ;;  %v1351_v51 = vpop.f32.mrb[9].mxu1  ;;  %v695_v10 = vadd.f32 %v3286_v44, %v583_v12 }
 0x4b0   : > { %v1369_v63 = vmax.f32 %v1275_v14, %v1361_v1  ;;  %v1281_v24 = vadd.f32 %v1280_v22, %v1197_v32  ;;  %v1352_v13 = vadd.f32 %v1351_v51, %v1192_v59 }
 0x4b1   : > { %v1376_v52 = vadd.f32 %v1368_v47, %v689_v30  ;;  %v1364_v58 = vmul.f32 0.1, %v1279_v4  ;;  %v1362_v62 = vmul.f32 0.1, %v1350_v50 }
 0x4b2   : > { %v3505_v31 = vadd.f32 %v1369_v63, %v691_v2  ;;  %v1365_v0 = vmul.f32 0.1, %v1281_v24  ;;  %v1363_v55 = vmul.f32 0.1, %v1352_v13  ;;  %v1355_v3 = vpop.f32.mrb[10].mxu1 }
 0x4b3   : > { %v1384_v5 = vmul.f32 0.2, %v1376_v52  ;;  %v1372_v37 = vmax.f32 %v1279_v4, %v1364_v58  ;;  %v1370_v42 = vmax.f32 %v1350_v50, %v1362_v62  ;;  %v1356_v14 = vadd.f32 %v1355_v3, %v1197_v32  ;;  %v1357_v1 = vpop.f32.mrb[11].mxu1 }
 0x4b4   : > { %v1373_v59 = vmax.f32 %v1281_v24, %v1365_v0  ;;  %v1371_v30 = vmax.f32 %v1352_v13, %v1363_v55  ;;  %v1358_v47 = vadd.f32 %v1357_v1, %v1197_v32  ;;  %v784_v4 = vadd.f32 %v3288_v6, %v583_v12 }
 0x4b5   : > { %v3509_v22 = vmax.f32 %v1376_v52, %v1384_v5  ;;  %v1380_v7 = vadd.f32 %v1372_v37, %v695_v10  ;;  %v1378_v15 = vadd.f32 %v1370_v42, %v778_v29  ;;  %v1366_v2 = vmul.f32 0.1, %v1356_v14  ;;  %v1401_v37 = vld [vmem:[%s4251_s2 + $0x68] sm:$0xff] }
 0x4b6   : > { %v1381_v51 = vadd.f32 %v1373_v59, %v697_v46  ;;  %v1379_v44 = vadd.f32 %v1371_v30, %v780_v60  ;;  %v1367_v63 = vmul.f32 0.1, %v1358_v47  ;;  %2374 = vmatprep.mubr.msk.f32.mxu0 %vm1199_vm10, %v1401_v37  ;;  %2375 = vmatprep.mubr.msk.f32.mxu1 %vm1199_vm10, %v1401_v37  ;;  %v1403_v46 = vld [vmem:[%s4252_s3 + $0x60] sm:$0xff] }
 0x4b7   : > { %v1388_v53 = vmul.f32 0.2, %v1380_v7  ;;  %v1386_v23 = vmul.f32 0.2, %v1378_v15  ;;  %v1374_v50 = vmax.f32 %v1356_v14, %v1366_v2  ;;  %1408 = vrot.lane.b32.xlu1 %v3509_v22, %s2614_s23 }
 0x4b8   : > { %v1375_v24 = vmax.f32 %v1358_v47, %v1367_v63  ;;  %v1389_v12 = vmul.f32 0.2, %v1381_v51  ;;  %v1387_v62 = vmul.f32 0.2, %v1379_v44 }
 0x4b9   : > { %v3515_v32 = vmax.f32 %v1380_v7, %v1388_v53  ;;  %v3517_v13 = vmax.f32 %v1378_v15, %v1386_v23  ;;  %v1382_v42 = vadd.f32 %v1374_v50, %v784_v4  ;;  %v1385_v23 = vmul.f32 0.2, %v3505_v31 }
 0x4ba   : > { %v1383_v29 = vadd.f32 %v1375_v24, %v786_v9  ;;  %v3593_v60 = vmax.f32 %v1381_v51, %v1389_v12  ;;  %v3595_v10 = vmax.f32 %v1379_v44, %v1387_v62 }
 0x4bb   : > { %4314 = vst [vmem:[#allocation18_spill] sm:$0xff] %v3517_v13  ;;  %v1390_v52 = vmul.f32 0.2, %v1382_v42  ;;  %1410 = vrot.lane.b32.xlu0 %v3515_v32, %s2614_s23  ;;  %1416 = vrot.lane.b32.xlu1 %v3517_v13, %s2614_s23  ;;  %v3587_v53 = vmax.f32 %v3505_v31, %v1385_v23 }
 0x4bc   : > { %v1391_v0 = vmul.f32 0.2, %v1383_v29 }
 0x4bd   : > { %v3525_v58 = vmax.f32 %v1382_v42, %v1390_v52 }
 0x4be   : > { %v3601_v31 = vmax.f32 %v1383_v29, %v1391_v0 }
 0x4bf   : > { %1418 = vrot.lane.b32.xlu0 %v3525_v58, %s2614_s23  ;;  %1440 = vrot.lane.b32.xlu1 %v3509_v22, %s2612_s21 }
 0x4c3   : > { %1442 = vrot.lane.b32.xlu0 %v3515_v32, %s2612_s21  ;;  %1448 = vrot.lane.b32.xlu1 %v3517_v13, %s2612_s21 }
 0x4c7   : > { %1450 = vrot.lane.b32.xlu0 %v3525_v58, %s2612_s21  ;;  %1472 = vrot.lane.b32.xlu1 %v3509_v22, %s2615_s24 }
 0x4cb   : > { %1474 = vrot.lane.b32.xlu0 %v3515_v32, %s2615_s24  ;;  %1480 = vrot.lane.b32.xlu1 %v3517_v13, %s2615_s24 }
 0x4cf   : > { %1482 = vrot.lane.b32.xlu0 %v3525_v58, %s2615_s24  ;;  %1504 = vrot.lane.b32.xlu1 %v3509_v22, %s2613_s22 }
 0x4d3   : > { %1506 = vrot.lane.b32.xlu0 %v3515_v32, %s2613_s22  ;;  %1512 = vrot.lane.b32.xlu1 %v3517_v13, %s2613_s22 }
 0x4d7   : > { %1514 = vrot.lane.b32.xlu0 %v3525_v58, %s2613_s22  ;;  %1536 = vrot.lane.b32.xlu1 %v3509_v22, %s2616_s25 }
 0x4db   : > { %1538 = vrot.lane.b32.xlu0 %v3515_v32, %s2616_s25  ;;  %1544 = vrot.lane.b32.xlu1 %v3517_v13, %s2616_s25 }
 0x4df   : > { %1546 = vrot.lane.b32.xlu0 %v3525_v58, %s2616_s25  ;;  %1568 = vrot.lane.b32.xlu1 %v3509_v22, %s2618_s27 }
 0x4e3   : > { %1570 = vrot.lane.b32.xlu0 %v3515_v32, %s2618_s27  ;;  %1576 = vrot.lane.b32.xlu1 %v3517_v13, %s2618_s27 }
 0x4e7   : > { %1578 = vrot.lane.b32.xlu0 %v3525_v58, %s2618_s27  ;;  %1600 = vrot.lane.b32.xlu1 %v3509_v22, %s2617_s26 }
 0x4eb   : > { %1602 = vrot.lane.b32.xlu0 %v3515_v32, %s2617_s26  ;;  %1608 = vrot.lane.b32.xlu1 %v3517_v13, %s2617_s26 }
 0x4ef   : > { %1610 = vrot.lane.b32.xlu0 %v3525_v58, %s2617_s26  ;;  %1632 = vrot.lane.b32.xlu1 %v3509_v22, %s2620_s28 }
 0x4f3   : > { %1634 = vrot.lane.b32.xlu0 %v3515_v32, %s2620_s28  ;;  %1640 = vrot.lane.b32.xlu1 %v3517_v13, %s2620_s28 }
 0x4f7   : > { %1642 = vrot.lane.b32.xlu0 %v3525_v58, %s2620_s28  ;;  %1412 = vrot.lane.b32.xlu1 %v3587_v53, %s2614_s23 }
 0x4fb   : > { %1414 = vrot.lane.b32.xlu0 %v3593_v60, %s2614_s23  ;;  %1420 = vrot.lane.b32.xlu1 %v3595_v10, %s2614_s23 }
 0x4ff   : > { %1422 = vrot.lane.b32.xlu0 %v3601_v31, %s2614_s23  ;;  %1444 = vrot.lane.b32.xlu1 %v3587_v53, %s2612_s21 }
 0x503   : > { %1446 = vrot.lane.b32.xlu0 %v3593_v60, %s2612_s21  ;;  %1452 = vrot.lane.b32.xlu1 %v3595_v10, %s2612_s21 }
 0x507   : > { %1454 = vrot.lane.b32.xlu0 %v3601_v31, %s2612_s21  ;;  %1476 = vrot.lane.b32.xlu1 %v3587_v53, %s2615_s24 }
 0x50b   : > { %1478 = vrot.lane.b32.xlu0 %v3593_v60, %s2615_s24  ;;  %1484 = vrot.lane.b32.xlu1 %v3595_v10, %s2615_s24 }
 0x50f   : > { %1486 = vrot.lane.b32.xlu0 %v3601_v31, %s2615_s24  ;;  %1508 = vrot.lane.b32.xlu1 %v3587_v53, %s2613_s22 }
 0x513   : > { %1510 = vrot.lane.b32.xlu0 %v3593_v60, %s2613_s22  ;;  %1516 = vrot.lane.b32.xlu1 %v3595_v10, %s2613_s22 }
 0x517   : > { %1518 = vrot.lane.b32.xlu0 %v3601_v31, %s2613_s22  ;;  %1540 = vrot.lane.b32.xlu1 %v3587_v53, %s2616_s25 }
 0x51b   : > { %1542 = vrot.lane.b32.xlu0 %v3593_v60, %s2616_s25  ;;  %1548 = vrot.lane.b32.xlu1 %v3595_v10, %s2616_s25 }
 0x51f   : > { %1550 = vrot.lane.b32.xlu0 %v3601_v31, %s2616_s25  ;;  %1572 = vrot.lane.b32.xlu1 %v3587_v53, %s2618_s27 }
 0x523   : > { %1574 = vrot.lane.b32.xlu0 %v3593_v60, %s2618_s27  ;;  %1580 = vrot.lane.b32.xlu1 %v3595_v10, %s2618_s27 }
 0x527   : > { %1582 = vrot.lane.b32.xlu0 %v3601_v31, %s2618_s27  ;;  %1604 = vrot.lane.b32.xlu1 %v3587_v53, %s2617_s26 }
 0x529   : > { %v1409_v55 = vpop.permute.xlu1 %1408 }
 0x52b   : > { %1606 = vrot.lane.b32.xlu0 %v3593_v60, %s2617_s26  ;;  %1612 = vrot.lane.b32.xlu1 %v3595_v10, %s2617_s26 }
 0x52d   : > { %v1411_v3 = vpop.permute.xlu0 %1410  ;;  %v1417_v5 = vpop.permute.xlu1 %1416 }
 0x52f   : > { %1614 = vrot.lane.b32.xlu0 %v3601_v31, %s2617_s26  ;;  %1636 = vrot.lane.b32.xlu1 %v3587_v53, %s2620_s28 }
 0x531   : > { %v1419_v14 = vpop.permute.xlu0 %1418  ;;  %v3660_v1 = vpop.permute.xlu1 %1440 }
 0x533   : > { %1638 = vrot.lane.b32.xlu0 %v3593_v60, %s2620_s28  ;;  %1644 = vrot.lane.b32.xlu1 %v3595_v10, %s2620_s28 }
 0x535   : > { %v3669_v59 = vpop.permute.xlu0 %1442  ;;  %v3671_v30 = vpop.permute.xlu1 %1448 }
 0x537   : > { %1646 = vrot.lane.b32.xlu0 %v3601_v31, %s2620_s28  ;;  %1666 = vperm.xlu1 %2581, %v1403_v46  }
 0x539   : > { %v3675_v47 = vpop.permute.xlu0 %1450  ;;  %v3677_v7 = vpop.permute.xlu1 %1472 }
 0x53d   : > { %v3679_v15 = vpop.permute.xlu0 %1474  ;;  %v3681_v2 = vpop.permute.xlu1 %1480 }
 0x541   : > { %v3683_v51 = vpop.permute.xlu0 %1482  ;;  %v3685_v44 = vpop.permute.xlu1 %1504 }
 0x545   : > { %v3687_v63 = vpop.permute.xlu0 %1506  ;;  %v3689_v4 = vpop.permute.xlu1 %1512 }
 0x549   : > { %v3691_v50 = vpop.permute.xlu0 %1514  ;;  %v3693_v9 = vpop.permute.xlu1 %1536 }
 0x54d   : > { %v3695_v24 = vpop.permute.xlu0 %1538  ;;  %v3697_v42 = vpop.permute.xlu1 %1544 }
 0x551   : > { %v3699_v29 = vpop.permute.xlu0 %1546  ;;  %v3701_v52 = vpop.permute.xlu1 %1568 }
 0x555   : > { %v3703_v23 = vpop.permute.xlu0 %1570  ;;  %v3705_v12 = vpop.permute.xlu1 %1576 }
 0x556   : > { %4315 = vst [vmem:[#allocation19_spill] sm:$0xff] %v3703_v23 }
 0x559   : > { %v3707_v62 = vpop.permute.xlu0 %1578  ;;  %v3709_v0 = vpop.permute.xlu1 %1600 }
 0x55a   : > { %4316 = vst [vmem:[#allocation20_spill] sm:$0xff] %v3707_v62  ;;  %4317 = vst [vmem:[#allocation21_spill] sm:$0xff] %v3709_v0  ;;  %v4326_v62 = vld [vmem:[#allocation5_spill] sm:$0xff] }
 0x55d   : > { %v3711_v37 = vpop.permute.xlu0 %1602  ;;  %v3713_v46 = vpop.permute.xlu1 %1608 }
 0x55e   : > { %4318 = vst [vmem:[#allocation22_spill] sm:$0xff] %v3711_v37  ;;  %4319 = vst [vmem:[#allocation23_spill] sm:$0xff] %v3713_v46 }
 0x561   : > { %v3715_v45 = vpop.permute.xlu0 %1610  ;;  %v3717_v6 = vpop.permute.xlu1 %1632 }
 0x562   : > { %4320 = vst [vmem:[#allocation24_spill] sm:$0xff] %v3715_v45  ;;  %4321 = vst [vmem:[#allocation25_spill] sm:$0xff] %v3717_v6 }
 0x565   : > { %v3719_v40 = vpop.permute.xlu0 %1634  ;;  %v3721_v38 = vpop.permute.xlu1 %1640 }
 0x566   : > { %4322 = vst [vmem:[#allocation26_spill] sm:$0xff] %v3719_v40  ;;  %4323 = vst [vmem:[#allocation27_spill] sm:$0xff] %v3721_v38 }
 0x569   : > { %v3723_v48 = vpop.permute.xlu0 %1642  ;;  %v1413_v41 = vpop.permute.xlu1 %1412 }
 0x56a   : > { %4324 = vst [vmem:[#allocation28_spill] sm:$0xff] %v3723_v48  ;;  %v1428_v25 = vsel %vm244_vm0, %v1409_v55, %v1413_v41  ;;  %v1426_v54 = vsel %vm244_vm0, %v1413_v41, %v1417_v5 }
 0x56b   : > { %v1433_v46 = vmul.f32 %v1428_v25, %v2808_v39 }
 0x56d   : > { %v1415_v18 = vpop.permute.xlu0 %1414  ;;  %v1421_v0 = vpop.permute.xlu1 %1420 }
 0x56e   : > { %v1429_v37 = vsel %vm244_vm0, %v1411_v3, %v1415_v18  ;;  %v1427_v6 = vsel %vm244_vm0, %v1415_v18, %v1419_v14  ;;  %v1424_v38 = vsel %vm244_vm0, %v1417_v5, %v1421_v0  ;;  %v1430_v48 = vsel %vm244_vm0, %v1421_v0, %v1409_v55 }
 0x56f   : > { %v1437_v40 = vmul.f32 %v1429_v37, %v2808_v39  ;;  %v1438_v23 = vmul.f32 %v1427_v6, %v2818_v43  ;;  %v4325_v37 = vld [vmem:[#allocation4_spill] sm:$0xff]  ;;  %v1435_v13 = vmul.f32 %v1424_v38, %v4326_v62 }
 0x570   : > { %v1432_v39 = vmul.f32 %v1430_v48, %v4325_v37 }
 0x571   : > { %v1423_v45 = vpop.permute.xlu0 %1422  ;;  %v1445_v11 = vpop.permute.xlu1 %1444  ;;  %v2474_v8 = vpack.c.bf16 %v1437_v40, %v1433_v46  ;;  %v1434_v40 = vmul.f32 %v1426_v54, %v2818_v43 }
 0x572   : > { %v1425_v25 = vsel %vm244_vm0, %v1419_v14, %v1423_v45  ;;  %v1431_v18 = vsel %vm244_vm0, %v1423_v45, %v1411_v3  ;;  %v1460_v41 = vsel %vm277_vm1, %v3660_v1, %v1445_v11  ;;  %v4327_v45 = vld [vmem:[#allocation2_spill] sm:$0xff] }
 0x573   : > { %v1436_v55 = vmul.f32 %v1431_v18, %v4325_v37  ;;  %v1439_v0 = vmul.f32 %v1425_v25, %v4326_v62  ;;  %2475 = vmatprep.subr.bf16.mxu0 %v2474_v8  ;;  %v2512_v38 = vpack.c.bf16 %v1438_v23, %v1434_v40  ;;  %v1465_v3 = vmul.f32 %v1460_v41, %v4327_v45 }
 0x575   : > { %v2476_v6 = vpack.c.bf16 %v1436_v55, %v1432_v39  ;;  %v1447_v5 = vpop.permute.xlu0 %1446  ;;  %v1453_v14 = vpop.permute.xlu1 %1452  ;;  %v2510_v46 = vpack.c.bf16 %v1439_v0, %v1435_v13  ;;  %v1458_v13 = vsel %vm277_vm1, %v1445_v11, %v3671_v30 }
 0x576   : > { %v1461_v48 = vsel %vm277_vm1, %v3669_v59, %v1447_v5  ;;  %v1459_v8 = vsel %vm277_vm1, %v1447_v5, %v3675_v47  ;;  %v1456_v39 = vsel %vm277_vm1, %v3671_v30, %v1453_v14  ;;  %v1462_v54 = vsel %vm277_vm1, %v1453_v14, %v3660_v1 }
 0x577   : > { %v1469_v25 = vmul.f32 %v1461_v48, %v4327_v45  ;;  %2477 = vmatpush1.bf16.msra.mxu0 %v2476_v6  ;;  %2511 = vmatprep.subr.bf16.mxu1 %v2510_v46  ;;  %v1470_v0 = vmul.f32 %v1459_v8, %v2792_v33  ;;  %v1464_v1 = vmul.f32 %v1462_v54, %v2777_v26 }
 0x578   : > { %2513 = vmatpush1.bf16.msra.mxu1 %v2512_v38  ;;  %v1467_v6 = vmul.f32 %v1456_v39, %v2782_v27  ;;  %v1466_v5 = vmul.f32 %v1458_v13, %v2792_v33 }
 0x579   : > { %v1455_v23 = vpop.permute.xlu0 %1454  ;;  %v1477_v18 = vpop.permute.xlu1 %1476  ;;  %v2478_v55 = vpack.c.bf16 %v1469_v25, %v1465_v3 }
 0x57a   : > { %v1457_v41 = vsel %vm277_vm1, %v3675_v47, %v1455_v23  ;;  %v1463_v40 = vsel %vm277_vm1, %v1455_v23, %v3669_v59  ;;  %v1490_v14 = vsel %vm310_vm2, %v1477_v18, %v3681_v2  ;;  %v1492_v47 = vsel %vm310_vm2, %v3677_v7, %v1477_v18 }
 0x57b   : > { %v1468_v11 = vmul.f32 %v1463_v40, %v2777_v26  ;;  %v1471_v30 = vmul.f32 %v1457_v41, %v2782_v27  ;;  %2479 = vmatprep.subr.bf16.mxu0 %v2478_v55  ;;  %v2516_v3 = vpack.c.bf16 %v1470_v0, %v1466_v5  ;;  %v1497_v39 = vmul.f32 %v1492_v47, %v2828_v49 }
 0x57c   : > { %v1498_v54 = vmul.f32 %v1490_v14, %v2842_v57 }
 0x57d   : > { %v2480_v59 = vpack.c.bf16 %v1468_v11, %v1464_v1  ;;  %v1479_v46 = vpop.permute.xlu0 %1478  ;;  %v1485_v48 = vpop.permute.xlu1 %1484  ;;  %v2514_v38 = vpack.c.bf16 %v1471_v30, %v1467_v6 }
 0x57e   : > { %v1491_v8 = vsel %vm310_vm2, %v1479_v46, %v3683_v51  ;;  %v1493_v25 = vsel %vm310_vm2, %v3679_v15, %v1479_v46  ;;  %v1488_v18 = vsel %vm310_vm2, %v3681_v2, %v1485_v48  ;;  %v1494_v55 = vsel %vm310_vm2, %v1485_v48, %v3677_v7 }
 0x57f   : > { %v1501_v13 = vmul.f32 %v1493_v25, %v2828_v49  ;;  %v1502_v23 = vmul.f32 %v1491_v8, %v2842_v57  ;;  %2481 = vmatpush1.bf16.msra.mxu0 %v2480_v59  ;;  %2515 = vmatprep.subr.bf16.mxu1 %v2514_v38  ;;  %v1496_v2 = vmul.f32 %v1494_v55, %v2839_v56 }
 0x580   : > { %2517 = vmatpush1.bf16.msra.mxu1 %v2516_v3  ;;  %v1499_v30 = vmul.f32 %v1488_v18, %v2849_v61 }
 0x581   : > { %v2520_v0 = vpack.c.bf16 %v1502_v23, %v1498_v54  ;;  %v1487_v41 = vpop.permute.xlu0 %1486  ;;  %v1509_v40 = vpop.permute.xlu1 %1508  ;;  %v2482_v1 = vpack.c.bf16 %v1501_v13, %v1497_v39 }
 0x582   : > { %v1489_v6 = vsel %vm310_vm2, %v3683_v51, %v1487_v41  ;;  %v1495_v11 = vsel %vm310_vm2, %v1487_v41, %v3679_v15  ;;  %v1522_v14 = vsel %vm343_vm3, %v1509_v40, %v3689_v4  ;;  %v1524_v51 = vsel %vm343_vm3, %v3685_v44, %v1509_v40 }
 0x583   : > { %v1500_v7 = vmul.f32 %v1495_v11, %v2839_v56  ;;  %v1503_v5 = vmul.f32 %v1489_v6, %v2849_v61  ;;  %2483 = vmatprep.subr.bf16.mxu0 %v2482_v1  ;;  %v1529_v3 = vmul.f32 %v1524_v51, %v2785_v28  ;;  %v1530_v8 = vmul.f32 %v1522_v14, %v2798_v35 }
 0x584   : > { %v2490_v14 = vpack.c.bf16 %v3593_v60, %v3587_v53  ;;  %v2526_v53 = vpack.c.bf16 %v3601_v31, %v3595_v10 }
 0x585   : > { %v2484_v47 = vpack.c.bf16 %v1500_v7, %v1496_v2  ;;  %v1511_v59 = vpop.permute.xlu0 %1510  ;;  %v1517_v15 = vpop.permute.xlu1 %1516  ;;  %v2518_v46 = vpack.c.bf16 %v1503_v5, %v1499_v30 }
 0x586   : > { %v1523_v48 = vsel %vm343_vm3, %v1511_v59, %v3691_v50  ;;  %v1525_v38 = vsel %vm343_vm3, %v3687_v63, %v1511_v59  ;;  %v1520_v54 = vsel %vm343_vm3, %v3689_v4, %v1517_v15  ;;  %v1526_v13 = vsel %vm343_vm3, %v1517_v15, %v3685_v44 }
 0x587   : > { %v1533_v25 = vmul.f32 %v1525_v38, %v2785_v28  ;;  %v1534_v39 = vmul.f32 %v1523_v48, %v2798_v35  ;;  %2485 = vmatpush1.bf16.msra.mxu0 %v2484_v47  ;;  %2519 = vmatprep.subr.bf16.mxu1 %v2518_v46  ;;  %v1528_v4 = vmul.f32 %v1526_v13, %v2795_v34 }
 0x588   : > { %2521 = vmatpush1.bf16.msra.mxu1 %v2520_v0  ;;  %v1531_v6 = vmul.f32 %v1520_v54, %v2801_v36  ;;  %v4328_v54 = vpack.c.bf16 %v3515_v32, %v3509_v22  ;;  %v4331_v22 = vld [vmem:[#allocation20_spill] sm:$0xff] }
 0x589   : > { %v2524_v23 = vpack.c.bf16 %v1534_v39, %v1530_v8  ;;  %v1519_v18 = vpop.permute.xlu0 %1518  ;;  %v1541_v55 = vpop.permute.xlu1 %1540  ;;  %v2486_v41 = vpack.c.bf16 %v1533_v25, %v1529_v3 }
 0x58a   : > { %v1521_v40 = vsel %vm343_vm3, %v3691_v50, %v1519_v18  ;;  %v1527_v1 = vsel %vm343_vm3, %v1519_v18, %v3687_v63  ;;  %v1554_v0 = vsel %vm376_vm5, %v1541_v55, %v3697_v42  ;;  %v1556_v51 = vsel %vm376_vm5, %v3693_v9, %v1541_v55  ;;  %v4329_v18 = vld [vmem:[#allocation18_spill] sm:$0xff] }
 0x58b   : > { %v1532_v44 = vmul.f32 %v1527_v1, %v2795_v34  ;;  %v1535_v11 = vmul.f32 %v1521_v40, %v2801_v36  ;;  %2487 = vmatprep.subr.bf16.mxu0 %v2486_v41  ;;  %v1561_v47 = vmul.f32 %v1554_v0, %v2894_v20  ;;  %v1560_v8 = vmul.f32 %v1556_v51, %v2888_v17  ;;  %v4334_v0 = vld [vmem:[#allocation12_spill] sm:$0xff] }
 0x58c   : > { %v4330_v55 = vpack.c.bf16 %v3525_v58, %v4329_v18 }
 0x58d   : > { %v2488_v2 = vpack.c.bf16 %v1532_v44, %v1528_v4  ;;  %v1543_v30 = vpop.permute.xlu0 %1542  ;;  %v1549_v50 = vpop.permute.xlu1 %1548  ;;  %v2522_v7 = vpack.c.bf16 %v1535_v11, %v1531_v6  ;;  %v4332_v4 = vld [vmem:[#allocation19_spill] sm:$0xff]  ;;  %v4333_v44 = vld [vmem:[#allocation10_spill] sm:$0xff] }
 0x58e   : > { %v1555_v63 = vsel %vm376_vm5, %v1543_v30, %v3699_v29  ;;  %v1557_v5 = vsel %vm376_vm5, %v3695_v24, %v1543_v30  ;;  %v1552_v15 = vsel %vm376_vm5, %v3697_v42, %v1549_v50  ;;  %v1558_v46 = vsel %vm376_vm5, %v1549_v50, %v3693_v9 }
 0x58f   : > { %v1565_v59 = vmul.f32 %v1555_v63, %v2894_v20  ;;  %2489 = vmatpush1.bf16.msra.mxu0 %v2488_v2  ;;  %2523 = vmatprep.subr.bf16.mxu1 %v2522_v7  ;;  %v1564_v60 = vmul.f32 %v1557_v5, %v2888_v17  ;;  %v1562_v25 = vmul.f32 %v1552_v15, %v2897_v21  ;;  %v4335_v15 = vld [vmem:[#allocation13_spill] sm:$0xff] }
 0x590   : > { %2491 = vmatprep.subr.bf16.mxu0 %v2490_v14  ;;  %2525 = vmatpush1.bf16.msra.mxu1 %v2524_v23  ;;  %v1563_v10 = vmul.f32 %v1558_v46, %v2891_v19  ;;  %v4336_v46 = vld [vmem:[#allocation11_spill] sm:$0xff] }
 0x591   : > { %v1551_v48 = vpop.permute.xlu0 %1550  ;;  %v1573_v38 = vpop.permute.xlu1 %1572  ;;  %v2494_v3 = vpack.c.bf16 %v1565_v59, %v1561_v47  ;;  %2527 = vmatprep.subr.bf16.mxu1 %v2526_v53  ;;  %v2496_v13 = vpack.c.bf16 %v1564_v60, %v1560_v8 }
 0x592   : > { %v1553_v42 = vsel %vm376_vm5, %v3699_v29, %v1551_v48  ;;  %v1559_v9 = vsel %vm376_vm5, %v1551_v48, %v3695_v24  ;;  %v1586_v29 = vsel %vm409_vm7, %v1573_v38, %v3705_v12  ;;  %v1588_v24 = vsel %vm409_vm7, %v3701_v52, %v1573_v38  ;;  %v4337_v48 = vld [vmem:[#allocation23_spill] sm:$0xff] }
 0x593   : > { %v1566_v31 = vmul.f32 %v1553_v42, %v2897_v21  ;;  %v1567_v39 = vmul.f32 %v1559_v9, %v2891_v19  ;;  %2493 = vmatpush1.bf16.msra.mxu0 %v4328_v54  ;;  %v1592_v11 = vmul.f32 %v1588_v24, %v4333_v44  ;;  %v1593_v2 = vmul.f32 %v1586_v29, %v4334_v0  ;;  %v4340_v54 = vld [vmem:[#allocation22_spill] sm:$0xff] }
 0x594   : > { %2495 = vmatprep.subr.bf16.mxu0 %v2494_v3  ;;  %2529 = vmatpush1.bf16.msra.mxu1 %v4330_v55  ;;  %v4338_v3 = vld [vmem:[#allocation21_spill] sm:$0xff]  ;;  %v4341_v24 = vld [vmem:[#allocation6_spill] sm:$0xff] }
 0x595   : > { %v2532_v23 = vpack.c.bf16 %v1566_v31, %v1562_v25  ;;  %v1575_v41 = vpop.permute.xlu0 %1574  ;;  %v1581_v40 = vpop.permute.xlu1 %1580  ;;  %v2530_v1 = vpack.c.bf16 %v1567_v39, %v1563_v10  ;;  %v4339_v31 = vld [vmem:[#allocation24_spill] sm:$0xff] }
 0x596   : > { %v1587_v32 = vsel %vm409_vm7, %v1575_v41, %v4331_v22  ;;  %v1589_v6 = vsel %vm409_vm7, %v4332_v4, %v1575_v41  ;;  %v1584_v50 = vsel %vm409_vm7, %v3705_v12, %v1581_v40  ;;  %v1590_v7 = vsel %vm409_vm7, %v1581_v40, %v3701_v52 }
 0x597   : > { %v1596_v30 = vmul.f32 %v1589_v6, %v4333_v44  ;;  %v1597_v58 = vmul.f32 %v1587_v32, %v4334_v0  ;;  %2497 = vmatpush1.bf16.msra.mxu0 %v2496_v13  ;;  %2531 = vmatprep.subr.bf16.mxu1 %v2530_v1  ;;  %v1594_v12 = vmul.f32 %v1584_v50, %v4335_v15  ;;  %v4344_v50 = vld [vmem:[#allocation7_spill] sm:$0xff] }
 0x598   : > { %2533 = vmatpush1.bf16.msra.mxu1 %v2532_v23  ;;  %v1595_v53 = vmul.f32 %v1590_v7, %v4336_v46  ;;  %v4342_v23 = vld [vmem:[#allocation8_spill] sm:$0xff] }
 0x599   : > { %v2500_v63 = vpack.c.bf16 %v1596_v30, %v1592_v11  ;;  %v1583_v5 = vpop.permute.xlu0 %1582  ;;  %v1605_v14 = vpop.permute.xlu1 %1604  ;;  %v2498_v51 = vpack.c.bf16 %v1597_v58, %v1593_v2  ;;  %v4343_v30 = vld [vmem:[#allocation9_spill] sm:$0xff] }
 0x59a   : > { %v1585_v47 = vsel %vm409_vm7, %v4331_v22, %v1583_v5  ;;  %v1591_v59 = vsel %vm409_vm7, %v1583_v5, %v4332_v4  ;;  %v1618_v38 = vsel %vm442_vm6, %v1605_v14, %v4337_v48  ;;  %v1620_v8 = vsel %vm442_vm6, %v4338_v3, %v1605_v14  ;;  %v4345_v14 = vld [vmem:[#allocation27_spill] sm:$0xff] }
 0x59b   : > { %v1598_v52 = vmul.f32 %v1585_v47, %v4335_v15  ;;  %v1599_v60 = vmul.f32 %v1591_v59, %v4336_v46  ;;  %2499 = vmatprep.subr.bf16.mxu0 %v2498_v51  ;;  %v1624_v13 = vmul.f32 %v1620_v8, %v4341_v24  ;;  %v1625_v18 = vmul.f32 %v1618_v38, %v4342_v23  ;;  %v4346_v47 = vld [vmem:[#allocation25_spill] sm:$0xff] }
 0x59c   : > { %2501 = vmatpush1.bf16.msra.mxu0 %v2500_v63 }
 0x59d   : > { %v2536_v42 = vpack.c.bf16 %v1598_v52, %v1594_v12  ;;  %v1607_v9 = vpop.permute.xlu0 %1606  ;;  %v1613_v25 = vpop.permute.xlu1 %1612  ;;  %v2534_v10 = vpack.c.bf16 %v1599_v60, %v1595_v53 }
 0x59e   : > { %v1619_v39 = vsel %vm442_vm6, %v1607_v9, %v4339_v31  ;;  %v1621_v29 = vsel %vm442_vm6, %v4340_v54, %v1607_v9  ;;  %v1616_v40 = vsel %vm442_vm6, %v4337_v48, %v1613_v25  ;;  %v1622_v1 = vsel %vm442_vm6, %v1613_v25, %v4338_v3  ;;  %v4347_v48 = vld [vmem:[#allocation28_spill] sm:$0xff]  ;;  %v4348_v3 = vld [vmem:[#allocation26_spill] sm:$0xff] }
 0x59f   : > { %v1628_v55 = vmul.f32 %v1621_v29, %v4341_v24  ;;  %v1629_v41 = vmul.f32 %v1619_v39, %v4342_v23  ;;  %2535 = vmatprep.subr.bf16.mxu1 %v2534_v10  ;;  %v1626_v58 = vmul.f32 %v1616_v40, %v4343_v30  ;;  %v1627_v7 = vmul.f32 %v1622_v1, %v4344_v50  ;;  %v4350_v25 = vld [vmem:[#allocation14_spill] sm:$0xff]  ;;  %v4351_v1 = vld [vmem:[#allocation16_spill] sm:$0xff] }
 0x5a0   : > { %2537 = vmatpush1.bf16.msra.mxu1 %v2536_v42  ;;  %v4349_v42 = vld [vmem:[#allocation15_spill] sm:$0xff] }
 0x5a1   : > { %v2504_v22 = vpack.c.bf16 %v1628_v55, %v1624_v13  ;;  %v1615_v32 = vpop.permute.xlu0 %1614  ;;  %v1637_v4 = vpop.permute.xlu1 %1636  ;;  %v2502_v6 = vpack.c.bf16 %v1629_v41, %v1625_v18 }
 0x5a2   : > { %v1617_v11 = vsel %vm442_vm6, %v4339_v31, %v1615_v32  ;;  %v1623_v2 = vsel %vm442_vm6, %v1615_v32, %v4340_v54  ;;  %v1650_v51 = vsel %vm475_vm8, %v1637_v4, %v4345_v14  ;;  %v1652_v59 = vsel %vm475_vm8, %v4346_v47, %v1637_v4  ;;  %v4352_v32 = vld [vmem:[#allocation17_spill] sm:$0xff] }
 0x5a3   : > { %v1630_v63 = vmul.f32 %v1617_v11, %v4343_v30  ;;  %v1631_v5 = vmul.f32 %v1623_v2, %v4344_v50  ;;  %2503 = vmatprep.subr.bf16.mxu0 %v2502_v6  ;;  %v1656_v9 = vmul.f32 %v4349_v42, %v1652_v59  ;;  %v1657_v10 = vmul.f32 %v4350_v25, %v1650_v51  ;;  %v1400_v2 = vld [vmem:[%s4251_s2 + $0x60] sm:$0xff] }
 0x5a4   : > { %2505 = vmatpush1.bf16.msra.mxu0 %v2504_v22 }
 0x5a5   : > { %v2540_v12 = vpack.c.bf16 %v1630_v63, %v1626_v58  ;;  %v1639_v53 = vpop.permute.xlu0 %1638  ;;  %v1645_v52 = vpop.permute.xlu1 %1644  ;;  %v2538_v60 = vpack.c.bf16 %v1631_v5, %v1627_v7  ;;  %v4353_v63 = vmov 0.0  }
 0x5a6   : > { %v1651_v38 = vsel %vm475_vm8, %v1639_v53, %v4347_v48  ;;  %v1653_v8 = vsel %vm475_vm8, %v4348_v3, %v1639_v53  ;;  %v1648_v54 = vsel %vm475_vm8, %v4345_v14, %v1645_v52  ;;  %v1654_v29 = vsel %vm475_vm8, %v1645_v52, %v4346_v47 }
 0x5a7   : > { %v1660_v31 = vmul.f32 %v4349_v42, %v1653_v8  ;;  %v1661_v39 = vmul.f32 %v4350_v25, %v1651_v38  ;;  %2539 = vmatprep.subr.bf16.mxu1 %v2538_v60  ;;  %v1658_v22 = vmul.f32 %v4351_v1, %v1648_v54  ;;  %v1659_v4 = vmul.f32 %v4352_v32, %v1654_v29 }
 0x5a8   : > { %2541 = vmatpush1.bf16.msra.mxu1 %v2540_v12 }
 0x5a9   : > { %v2508_v13 = vpack.c.bf16 %v1660_v31, %v1656_v9  ;;  %v1647_v18 = vpop.permute.xlu0 %1646  ;;  %v2506_v55 = vpack.c.bf16 %v1661_v39, %v1657_v10 }
 0x5aa   : > { %v1649_v41 = vsel %vm475_vm8, %v4347_v48, %v1647_v18  ;;  %v1655_v40 = vsel %vm475_vm8, %v1647_v18, %v4348_v3 }
 0x5ab   : > { %v1662_v6 = vmul.f32 %v4351_v1, %v1649_v41  ;;  %v1663_v11 = vmul.f32 %v4352_v32, %v1655_v40  ;;  %2507 = vmatprep.subr.bf16.mxu0 %v2506_v55 }
 0x5ac   : > { %2509 = vmatpush1.bf16.msra.mxu0 %v2508_v13 }
 0x5ad   : > { %v2544_v58 = vpack.c.bf16 %v1662_v6, %v1658_v22  ;;  %v2542_v7 = vpack.c.bf16 %v1663_v11, %v1659_v4 }
 0x5af   : > { %1737 = vmatmul.mubr.f32.vlgmr.msra.gmra.mrb[12].mxu0 %v1400_v2  ;;  %2543 = vmatprep.subr.bf16.mxu1 %v2542_v7 }
 0x5b0   : > { %2545 = vmatpush1.bf16.msra.mxu1 %v2544_v58  ;;  %2170 = vmatprep.mubr.f32.mxu0 %v4353_v63 }
 0x5b3   : > { %1808 = vmatmul.mubr.f32.vlgmr.msra.gmra.mrb[12].mxu1 %v1400_v2 }
 0x5b4   : > { %2241 = vmatprep.mubr.f32.mxu1 %v4353_v63 }
 0x5b6   : > { %v1667_v5 = vpop.permute.xlu1 %1666 }
 0x682   : > { %v1738_v14 = vpop.f32.mrb[12].mxu0 }
 0x683   : > { %v3988_v51 = vadd.f32 %v1738_v14, %v1667_v5  ;;  %v1740_v47 = vpop.f32.mrb[13].mxu0 }
 0x684   : > { %v3990_v59 = vadd.f32 %v1740_v47, %v1667_v5 }
 0x685   : > { %v1814_v12 = vsel %vm548_vm4, %v3988_v51, 0.0  ;;  %v1820_v53 = vmul.f32 %v3988_v51, %v3988_v51 }
 0x686   : > { %v1809_v52 = vpop.f32.mrb[12].mxu1  ;;  %v1815_v60 = vsel %vm548_vm4, %v3990_v59, 0.0  ;;  %v1821_v48 = vmul.f32 %v3990_v59, %v3990_v59 }
 0x687   : > { %v4000_v38 = vadd.f32 %v1809_v52, %v1667_v5  ;;  %v1811_v3 = vpop.f32.mrb[13].mxu1  ;;  %v1816_v8 = vadd.f32 %v1815_v60, %v1814_v12  ;;  %v1822_v9 = vsel %vm548_vm4, %v1820_v53, 0.0  ;;  %v1405_v12 = vld [vmem:[%s4252_s3 + $0x70] sm:$0xf]  ;;  %v1407_v52 = vld [vmem:[%s4252_s3 + $0x80] sm:$0xf] }
 0x688   : > { %v4002_v42 = vadd.f32 %v1811_v3, %v1667_v5  ;;  %v1823_v25 = vsel %vm548_vm4, %v1821_v48, 0.0 }
 0x689   : > { %1817 = vadd.xlane.f32.xlu0 %v1816_v8  ;;  %v1850_v10 = vsel %vm548_vm4, %v4000_v38, 0.0  ;;  %v1856_v31 = vmul.f32 %v4000_v38, %v4000_v38  ;;  %v1824_v13 = vadd.f32 %v1823_v25, %v1822_v9  ;;  %v1406_v9 = vld [vmem:[%s4252_s3 + $0x78] sm:$0xf] }
 0x68a   : > { %v1851_v39 = vsel %vm548_vm4, %v4002_v42, 0.0  ;;  %v1857_v54 = vmul.f32 %v4002_v42, %v4002_v42 }
 0x68b   : > { %v1852_v29 = vadd.f32 %v1851_v39, %v1850_v10  ;;  %v1858_v18 = vsel %vm548_vm4, %v1856_v31, 0.0 }
 0x68c   : > { %v1859_v55 = vsel %vm548_vm4, %v1857_v54, 0.0 }
 0x68d   : > { %1853 = vadd.xlane.f32.xlu1 %v1852_v29  ;;  %1825 = vadd.xlane.f32.xlu0 %v1824_v13  ;;  %v1860_v41 = vadd.f32 %v1859_v55, %v1858_v18 }
 0x691   : > { %1861 = vadd.xlane.f32.xlu0 %v1860_v41 }
 0x716   : > { %v1818_v40 = vpop.xlane.xlu0 %1817 }
 0x717   : > { %v1819_v1 = vmul.f32 0.00390625, %v1818_v40 }
 0x719   : > { %v1828_v4 = vmul.f32 %v1819_v1, %v1819_v1 }
 0x71a   : > { %v1854_v22 = vpop.xlane.xlu1 %1853  ;;  %v1826_v32 = vpop.xlane.xlu0 %1825 }
 0x71b   : > { %v1855_v6 = vmul.f32 0.00390625, %v1854_v22  ;;  %v1827_v11 = vmul.f32 0.00390625, %v1826_v32 }
 0x71d   : > { %v1829_v2 = vsub.f32 %v1827_v11, %v1828_v4  ;;  %v1864_v7 = vmul.f32 %v1855_v6, %v1855_v6 }
 0x71e   : > { %v1862_v58 = vpop.xlane.xlu0 %1861 }
 0x71f   : > { %v1830_v63 = vadd.f32 1e-05, %v1829_v2  ;;  %v1863_v5 = vmul.f32 0.00390625, %v1862_v58 }
 0x721   : > { %2592 = vrsqrt.f32 %v1830_v63  ;;  %v1865_v14 = vsub.f32 %v1863_v5, %v1864_v7 }
 0x723   : > { %v1866_v47 = vadd.f32 1e-05, %v1865_v14 }
 0x725   : > { %2594 = vrsqrt.f32 %v1866_v47 }
 0x72b   : > { %v2593_v53 = vpop.eup %2592 }
 0x72c   : > { %v1832_v60 = vmul.f32 %v2593_v53, %v1405_v12  ;;  %v1404_v53 = vld [vmem:[%s4252_s3 + $0x68] sm:$0xf] }
 0x72e   : > { %v1833_v48 = vadd.f32 %v1832_v60, %v1407_v52  ;;  %v1834_v3 = vmul.f32 %v1832_v60, %v1819_v1 }
 0x72f   : > { %v2595_v8 = vpop.eup %2594 }
 0x730   : > { %1838 = vperm.xlu1 %2581, %v1833_v48   ;;  %v1868_v25 = vmul.f32 %v2595_v8, %v1405_v12  ;;  %v1835_v10 = vsub.f32 %v1406_v9, %v1834_v3 }
 0x732   : > { %v1869_v31 = vadd.f32 %v1868_v25, %v1407_v52  ;;  %v1870_v39 = vmul.f32 %v1868_v25, %v1855_v6 }
 0x734   : > { %1845 = vperm.xlu1 %2581, %v1835_v10   ;;  %1874 = vperm.xlu0 %2580, %v1869_v31   ;;  %v1871_v54 = vsub.f32 %v1406_v9, %v1870_v39 }
 0x738   : > { %1881 = vperm.xlu1 %2581, %v1871_v54  }
 0x7af   : > { %v1839_v29 = vpop.permute.xlu1 %1838 }
 0x7b0   : > { %v1841_v13 = vmul.f32 %v1839_v29, %v3988_v51  ;;  %v1842_v18 = vmul.f32 %v1839_v29, %v3990_v59 }
 0x7b3   : > { %v1846_v55 = vpop.permute.xlu1 %1845  ;;  %v1875_v41 = vpop.permute.xlu0 %1874 }
 0x7b4   : > { %v1848_v40 = vadd.f32 %v1846_v55, %v1841_v13  ;;  %v1849_v1 = vadd.f32 %v1846_v55, %v1842_v18  ;;  %v1877_v4 = vmul.f32 %v1875_v41, %v4000_v38  ;;  %v1878_v11 = vmul.f32 %v1875_v41, %v4002_v42 }
 0x7b6   : > { %v1886_v22 = vmul.f32 0.1, %v1848_v40  ;;  %v1887_v32 = vmul.f32 0.1, %v1849_v1 }
 0x7b7   : > { %v1882_v6 = vpop.permute.xlu1 %1881 }
 0x7b8   : > { %v4029_v2 = vmax.f32 %v1848_v40, %v1886_v22  ;;  %v4031_v58 = vmax.f32 %v1849_v1, %v1887_v32  ;;  %v1884_v7 = vadd.f32 %v1882_v6, %v1877_v4  ;;  %v1885_v63 = vadd.f32 %v1882_v6, %v1878_v11 }
 0x7ba   : > { %v1888_v5 = vmul.f32 0.1, %v1884_v7  ;;  %v1889_v14 = vmul.f32 0.1, %v1885_v63  ;;  %1912 = vrot.lane.b32.xlu1 %v4031_v58, %s2612_s21  ;;  %1910 = vrot.lane.b32.xlu0 %v4029_v2, %s2612_s21 }
 0x7bc   : > { %v4037_v47 = vmax.f32 %v1884_v7, %v1888_v5  ;;  %v4039_v12 = vmax.f32 %v1885_v63, %v1889_v14 }
 0x7be   : > { %1916 = vrot.lane.b32.xlu1 %v4039_v12, %s2612_s21  ;;  %1914 = vrot.lane.b32.xlu0 %v4037_v47, %s2612_s21 }
 0x7c2   : > { %1944 = vrot.lane.b32.xlu1 %v4031_v58, %s2613_s22  ;;  %1942 = vrot.lane.b32.xlu0 %v4029_v2, %s2613_s22 }
 0x7c6   : > { %1948 = vrot.lane.b32.xlu1 %v4039_v12, %s2613_s22  ;;  %1946 = vrot.lane.b32.xlu0 %v4037_v47, %s2613_s22 }
 0x7ca   : > { %1896 = vrot.lane.b32.xlu1 %v4031_v58, %s2614_s23  ;;  %1894 = vrot.lane.b32.xlu0 %v4029_v2, %s2614_s23 }
 0x7ce   : > { %1900 = vrot.lane.b32.xlu1 %v4039_v12, %s2614_s23  ;;  %1898 = vrot.lane.b32.xlu0 %v4037_v47, %s2614_s23 }
 0x7d2   : > { %1928 = vrot.lane.b32.xlu1 %v4031_v58, %s2615_s24  ;;  %1926 = vrot.lane.b32.xlu0 %v4029_v2, %s2615_s24 }
 0x7d6   : > { %1932 = vrot.lane.b32.xlu1 %v4039_v12, %s2615_s24  ;;  %1930 = vrot.lane.b32.xlu0 %v4037_v47, %s2615_s24 }
 0x7da   : > { %1960 = vrot.lane.b32.xlu1 %v4031_v58, %s2616_s25  ;;  %1958 = vrot.lane.b32.xlu0 %v4029_v2, %s2616_s25 }
 0x7de   : > { %1964 = vrot.lane.b32.xlu1 %v4039_v12, %s2616_s25  ;;  %1962 = vrot.lane.b32.xlu0 %v4037_v47, %s2616_s25 }
 0x7e2   : > { %1992 = vrot.lane.b32.xlu1 %v4031_v58, %s2617_s26  ;;  %1990 = vrot.lane.b32.xlu0 %v4029_v2, %s2617_s26 }
 0x7e6   : > { %1996 = vrot.lane.b32.xlu1 %v4039_v12, %s2617_s26  ;;  %1994 = vrot.lane.b32.xlu0 %v4037_v47, %s2617_s26 }
 0x7ea   : > { %1976 = vrot.lane.b32.xlu1 %v4031_v58, %s2618_s27  ;;  %1974 = vrot.lane.b32.xlu0 %v4029_v2, %s2618_s27 }
 0x7ee   : > { %1980 = vrot.lane.b32.xlu1 %v4039_v12, %s2618_s27  ;;  %1978 = vrot.lane.b32.xlu0 %v4037_v47, %s2618_s27 }
 0x7f2   : > { %2008 = vrot.lane.b32.xlu1 %v4031_v58, %s2620_s28  ;;  %2006 = vrot.lane.b32.xlu0 %v4029_v2, %s2620_s28 }
 0x7f6   : > { %2012 = vrot.lane.b32.xlu1 %v4039_v12, %s2620_s28  ;;  %2010 = vrot.lane.b32.xlu0 %v4037_v47, %s2620_s28 }
 0x7fa   : > { %2088 = vperm.xlu0 %2580, %v1404_v53  }
 0x82c   : > { %v1913_v52 = vpop.permute.xlu1 %1912  ;;  %v1911_v60 = vpop.permute.xlu0 %1910 }
 0x82d   : > { %v1920_v54 = vsel %vm277_vm1, %v1911_v60, %v1913_v52 }
 0x82e   : > { %v1923_v22 = vmul.f32 %v1920_v54, %v4327_v45 }
 0x830   : > { %v1917_v48 = vpop.permute.xlu1 %1916  ;;  %v1915_v3 = vpop.permute.xlu0 %1914 }
 0x831   : > { %v1921_v29 = vsel %vm277_vm1, %v1917_v48, %v1911_v60  ;;  %v1919_v13 = vsel %vm277_vm1, %v1913_v52, %v1915_v3  ;;  %v1918_v55 = vsel %vm277_vm1, %v1915_v3, %v1917_v48 }
 0x832   : > { %v1922_v32 = vmul.f32 %v1921_v29, %v2777_v26  ;;  %v1924_v6 = vmul.f32 %v1919_v13, %v2792_v33  ;;  %v1925_v63 = vmul.f32 %v1918_v55, %v2782_v27  ;;  %v4354_v26 = vld [vmem:[#allocation3_spill] sm:$0xff] }
 0x834   : > { %v1945_v8 = vpop.permute.xlu1 %1944  ;;  %v1943_v9 = vpop.permute.xlu0 %1942  ;;  %v2026_v3 = vrot.slane %v1922_v32, 4 }
 0x835   : > { %v1952_v18 = vsel %vm343_vm3, %v1943_v9, %v1945_v8 }
 0x836   : > { %v1955_v7 = vmul.f32 %v1952_v18, %v2785_v28  ;;  %v2027_v28 = vrot.slane %v1923_v22, 4 }
 0x838   : > { %v1949_v25 = vpop.permute.xlu1 %1948  ;;  %v1947_v10 = vpop.permute.xlu0 %1946 }
 0x839   : > { %v1953_v41 = vsel %vm343_vm3, %v1949_v25, %v1943_v9  ;;  %v1951_v4 = vsel %vm343_vm3, %v1945_v8, %v1947_v10  ;;  %v1950_v14 = vsel %vm343_vm3, %v1947_v10, %v1949_v25  ;;  %v2028_v8 = vrot.slane %v1924_v6, 4 }
 0x83a   : > { %v1954_v5 = vmul.f32 %v1953_v41, %v2795_v34  ;;  %v1956_v45 = vmul.f32 %v1951_v4, %v2798_v35  ;;  %v2039_v35 = vrot.slane %v1955_v7, 4  ;;  %v1957_v9 = vmul.f32 %v1950_v14, %v2801_v36 }
 0x83b   : > { %v2029_v10 = vrot.slane %v1925_v63, 4 }
 0x83c   : > { %v1897_v31 = vpop.permute.xlu1 %1896  ;;  %v1895_v39 = vpop.permute.xlu0 %1894  ;;  %v2040_v29 = vrot.slane %v1956_v45, 4 }
 0x83d   : > { %v1904_v11 = vsel %vm244_vm0, %v1895_v39, %v1897_v31 }
 0x83e   : > { %v1907_v53 = vmul.f32 %v1904_v11, %v4354_v26 }
 0x840   : > { %v1901_v40 = vpop.permute.xlu1 %1900  ;;  %v1899_v1 = vpop.permute.xlu0 %1898  ;;  %v2071_v41 = vsel %vm548_vm4, %v1907_v53, %v2027_v28 }
 0x841   : > { %v1905_v52 = vsel %vm244_vm0, %v1901_v40, %v1895_v39  ;;  %v1903_v60 = vsel %vm244_vm0, %v1897_v31, %v1899_v1  ;;  %v1902_v27 = vsel %vm244_vm0, %v1899_v1, %v1901_v40  ;;  %v2038_v39 = vrot.slane %v1954_v5, 4 }
 0x842   : > { %v1906_v31 = vmul.f32 %v1905_v52, %v4325_v37  ;;  %v1908_v54 = vmul.f32 %v1903_v60, %v2818_v43  ;;  %v1909_v13 = vmul.f32 %v1902_v27, %v4326_v62  ;;  %v2041_v43 = vrot.slane %v1957_v9, 4 }
 0x844   : > { %v1929_v33 = vpop.permute.xlu1 %1928  ;;  %v1927_v48 = vpop.permute.xlu0 %1926  ;;  %v2070_v4 = vsel %vm548_vm4, %v1906_v31, %v2026_v3  ;;  %v2072_v11 = vsel %vm548_vm4, %v1908_v54, %v2028_v8  ;;  %v2073_v14 = vsel %vm548_vm4, %v1909_v13, %v2029_v10 }
 0x845   : > { %v1936_v34 = vsel %vm310_vm2, %v1927_v48, %v1929_v33 }
 0x846   : > { %v1939_v25 = vmul.f32 %v1936_v34, %v2828_v49 }
 0x848   : > { %v1933_v18 = vpop.permute.xlu1 %1932  ;;  %v1931_v55 = vpop.permute.xlu0 %1930  ;;  %v2075_v40 = vsel %vm548_vm4, %v1939_v25, %v2039_v35 }
 0x849   : > { %v1937_v36 = vsel %vm310_vm2, %v1933_v18, %v1927_v48  ;;  %v1934_v49 = vsel %vm310_vm2, %v1931_v55, %v1933_v18  ;;  %v1935_v37 = vsel %vm310_vm2, %v1929_v33, %v1931_v55  ;;  %v2546_v1 = vpack.c.bf16 %v2075_v40, %v2071_v41 }
 0x84a   : > { %v1938_v22 = vmul.f32 %v1937_v36, %v2839_v56  ;;  %v1940_v62 = vmul.f32 %v1935_v37, %v2842_v57  ;;  %v1941_v32 = vmul.f32 %v1934_v49, %v2849_v61 }
 0x84b   : > { %2547 = vmatprep.subr.bf16.mxu0 %v2546_v1 }
 0x84c   : > { %v2074_v6 = vsel %vm548_vm4, %v1938_v22, %v2038_v39  ;;  %v2076_v7 = vsel %vm548_vm4, %v1940_v62, %v2040_v29  ;;  %v1961_v63 = vpop.permute.xlu1 %1960  ;;  %v1959_v5 = vpop.permute.xlu0 %1958  ;;  %v2077_v45 = vsel %vm548_vm4, %v1941_v32, %v2041_v43 }
 0x84d   : > { %v2548_v56 = vpack.c.bf16 %v2074_v6, %v2070_v4  ;;  %v2554_v26 = vpack.c.bf16 %v2077_v45, %v2073_v14  ;;  %v2556_v57 = vpack.c.bf16 %v2076_v7, %v2072_v11  ;;  %v1968_v27 = vsel %vm376_vm5, %v1959_v5, %v1961_v63 }
 0x84e   : > { %v1970_v31 = vmul.f32 %v1968_v27, %v2888_v17 }
 0x84f   : > { %2549 = vmatpush1.bf16.msra.mxu0 %v2548_v56  ;;  %2555 = vmatprep.subr.bf16.mxu1 %v2554_v26 }
 0x850   : > { %v1965_v61 = vpop.permute.xlu1 %1964  ;;  %2557 = vmatpush1.bf16.msra.mxu1 %v2556_v57  ;;  %v1963_v53 = vpop.permute.xlu0 %1962  ;;  %v2050_v17 = vrot.slane %v1970_v31, 4 }
 0x851   : > { %v1966_v33 = vsel %vm376_vm5, %v1963_v53, %v1965_v61  ;;  %v1967_v48 = vsel %vm376_vm5, %v1961_v63, %v1963_v53  ;;  %v1969_v34 = vsel %vm376_vm5, %v1965_v61, %v1959_v5 }
 0x852   : > { %v1971_v25 = vmul.f32 %v1967_v48, %v2894_v20  ;;  %v1972_v10 = vmul.f32 %v1966_v33, %v2897_v21  ;;  %v1973_v54 = vmul.f32 %v1969_v34, %v2891_v19  ;;  %v2601_v48 = vld [vmem:[%s4250_s1 + $0x28] ss:$0 sm:$0xff] }
 0x854   : > { %v1993_v52 = vpop.permute.xlu1 %1992  ;;  %v1991_v60 = vpop.permute.xlu0 %1990  ;;  %v2051_v40 = vrot.slane %v1971_v25, 4  ;;  %v2052_v36 = vrot.slane %v1972_v10, 4  ;;  %v2053_v37 = vrot.slane %v1973_v54, 4 }
 0x855   : > { %v2000_v8 = vsel %vm442_vm6, %v1991_v60, %v1993_v52 }
 0x856   : > { %v2002_v29 = vmul.f32 %v2000_v8, %v4341_v24  ;;  %v2080_v11 = vsel %vm548_vm4, %v4037_v47, %v2052_v36  ;;  %v2079_v7 = vsel %vm548_vm4, %v4031_v58, %v2051_v40  ;;  %v1402_v8 = vld [vmem:[%s4251_s2 + $0x80] sm:$0xf]  ;;  %v2260_v40 = vrot.slane %v3988_v51, 4 }
 0x858   : > { %v1997_v28 = vpop.permute.xlu1 %1996  ;;  %v1995_v3 = vpop.permute.xlu0 %1994  ;;  %v2062_v19 = vrot.slane %v2002_v29, 4 }
 0x859   : > { %v2001_v35 = vsel %vm442_vm6, %v1997_v28, %v1991_v60  ;;  %v1999_v9 = vsel %vm442_vm6, %v1993_v52, %v1995_v3  ;;  %v1998_v39 = vsel %vm442_vm6, %v1995_v3, %v1997_v28  ;;  %v2600_v60 = vld [vmem:[%s4250_s1 + $0x38] ss:$0 sm:$0xff]  ;;  %v2602_v3 = vld [vmem:[%s4250_s1 + $0x30] ss:$0 sm:$0xff] }
 0x85a   : > { %v2005_v13 = vmul.f32 %v2001_v35, %v4344_v50  ;;  %v2003_v41 = vmul.f32 %v1999_v9, %v4342_v23  ;;  %v2004_v21 = vmul.f32 %v1998_v39, %v4343_v30 }
 0x85c   : > { %v1977_v18 = vpop.permute.xlu1 %1976  ;;  %v1975_v55 = vpop.permute.xlu0 %1974  ;;  %v2065_v1 = vrot.slane %v2005_v13, 4  ;;  %v2063_v50 = vrot.slane %v2003_v41, 4  ;;  %v2064_v62 = vrot.slane %v2004_v21, 4 }
 0x85d   : > { %v1984_v20 = vsel %vm409_vm7, %v1975_v55, %v1977_v18 }
 0x85e   : > { %v1986_v49 = vmul.f32 %v1984_v20, %v4333_v44 }
 0x860   : > { %v1981_v24 = vpop.permute.xlu1 %1980  ;;  %v1979_v43 = vpop.permute.xlu0 %1978  ;;  %v2082_v6 = vsel %vm548_vm4, %v1986_v49, %v2062_v19  ;;  %v2262_v49 = vrot.slane %v4000_v38, 4 }
 0x861   : > { %v1985_v22 = vsel %vm409_vm7, %v1981_v24, %v1975_v55  ;;  %v1982_v23 = vsel %vm409_vm7, %v1979_v43, %v1981_v24  ;;  %v1983_v30 = vsel %vm409_vm7, %v1977_v18, %v1979_v43 }
 0x862   : > { %v1989_v32 = vmul.f32 %v1985_v22, %v4336_v46  ;;  %v1987_v44 = vmul.f32 %v1983_v30, %v4334_v0  ;;  %v1988_v4 = vmul.f32 %v1982_v23, %v4335_v15  ;;  %v2081_v46 = vsel %vm548_vm4, %v4039_v12, %v2053_v37 }
 0x863   : > { %v2078_v15 = vsel %vm548_vm4, %v4029_v2, %v2050_v17  ;;  %v2261_v37 = vrot.slane %v3990_v59, 4 }
 0x864   : > { %v2084_v63 = vsel %vm548_vm4, %v1988_v4, %v2064_v62  ;;  %v2009_v5 = vpop.permute.xlu1 %2008  ;;  %v2007_v14 = vpop.permute.xlu0 %2006  ;;  %v2083_v45 = vsel %vm548_vm4, %v1987_v44, %v2063_v50  ;;  %v2085_v0 = vsel %vm548_vm4, %v1989_v32, %v2065_v1  ;;  %v2552_v57 = vpack.c.bf16 %v2082_v6, %v2078_v15 }
 0x865   : > { %v2550_v47 = vpack.c.bf16 %v2083_v45, %v2079_v7  ;;  %v2558_v56 = vpack.c.bf16 %v2085_v0, %v2081_v46  ;;  %v2560_v26 = vpack.c.bf16 %v2084_v63, %v2080_v11  ;;  %v2016_v58 = vsel %vm475_vm8, %v2007_v14, %v2009_v5 }
 0x866   : > { %v2018_v34 = vmul.f32 %v2603_v16, %v2016_v58  ;;  %v2263_v1 = vrot.slane %v4002_v42, 4 }
 0x867   : > { %2551 = vmatprep.subr.bf16.mxu0 %v2550_v47  ;;  %2559 = vmatprep.subr.bf16.mxu1 %v2558_v56 }
 0x868   : > { %v2013_v61 = vpop.permute.xlu1 %2012  ;;  %2553 = vmatpush1.bf16.msra.mxu0 %v2552_v57  ;;  %2561 = vmatpush1.bf16.msra.mxu1 %v2560_v26  ;;  %v2011_v53 = vpop.permute.xlu0 %2010 }
 0x869   : > { %v2017_v12 = vsel %vm475_vm8, %v2013_v61, %v2007_v14  ;;  %v2014_v52 = vsel %vm475_vm8, %v2011_v53, %v2013_v61  ;;  %v2015_v2 = vsel %vm475_vm8, %v2009_v5, %v2011_v53 }
 0x86a   : > { %v2021_v33 = vmul.f32 %v2600_v60, %v2017_v12  ;;  %v2019_v28 = vmul.f32 %v2601_v48, %v2015_v2  ;;  %v2020_v27 = vmul.f32 %v2602_v3, %v2014_v52 }
 0x86c   : > { %2376 = vmatprep.subr.msk.mxu0 %vm548_vm4, %v2019_v28  ;;  %2379 = vmatprep.subr.msk.mxu1 %vm548_vm4, %v2021_v33 }
 0x86d   : > { %2377 = vmatpush1.msk.msra.mxu0 %vm548_vm4, %v2018_v34  ;;  %2380 = vmatpush1.msk.msra.mxu1 %vm548_vm4, %v2020_v27 }
 0x86e   : > { %2378 = vmatmul.mubr.msk.f32.vlgmr.msra.gmra.mrb[14].mxu0 %vm585_vm9, %v1402_v8  ;;  %2381 = vmatmul.mubr.msk.f32.vlgmr.msra.gmra.mrb[14].mxu1 %vm585_vm9, %v1402_v8 }
 0x879   : > { %v2089_v35 = vpop.permute.xlu0 %2088 }
 0x941   : > { %v2172_v9 = vpop.f32.mrb[14].mxu0  ;;  %v2243_v25 = vpop.f32.mrb[14].mxu1 }
 0x942   : > { %v2173_v10 = vadd.f32 %v2172_v9, %v2089_v35  ;;  %v2244_v39 = vadd.f32 %v2243_v25, %v2089_v35  ;;  %v2174_v31 = vpop.f32.mrb[15].mxu0  ;;  %v2245_v54 = vpop.f32.mrb[15].mxu1 }
 0x943   : > { %v2175_v29 = vadd.f32 %v2174_v31, %v2089_v35  ;;  %v2246_v13 = vadd.f32 %v2245_v54, %v2089_v35 }
 0x944   : > { %v2248_v18 = vmul.f32 0.1, %v2173_v10  ;;  %v2250_v55 = vmul.f32 0.1, %v2244_v39 }
 0x945   : > { %v2249_v41 = vmul.f32 0.1, %v2175_v29  ;;  %v2251_v20 = vmul.f32 0.1, %v2246_v13 }
 0x946   : > { %v2252_v21 = vmax.f32 %v2173_v10, %v2248_v18  ;;  %v2254_v36 = vmax.f32 %v2244_v39, %v2250_v55 }
 0x947   : > { %v2253_v17 = vmax.f32 %v2175_v29, %v2249_v41  ;;  %v2255_v19 = vmax.f32 %v2246_v13, %v2251_v20 }
 0x948   : > { %v2268_v24 = vadd.f32 %v2260_v40, %v2252_v21  ;;  %v2270_v43 = vadd.f32 %v2262_v49, %v2254_v36 }
 0x949   : > { %v2269_v50 = vadd.f32 %v2261_v37, %v2253_v17  ;;  %v2271_v22 = vadd.f32 %v2263_v1, %v2255_v19 }
 0x94a   : > { %v2272_v23 = vmul.f32 0.2, %v2268_v24  ;;  %v2274_v30 = vmul.f32 0.2, %v2270_v43 }
 0x94b   : > { %v2273_v62 = vmul.f32 0.2, %v2269_v50  ;;  %v2275_v32 = vmul.f32 0.2, %v2271_v22 }
 0x94c   : > { %v2276_v44 = vmax.f32 %v2268_v24, %v2272_v23  ;;  %v2278_v51 = vmax.f32 %v2270_v43, %v2274_v30 }
 0x94d   : > { %v2277_v4 = vmax.f32 %v2269_v50, %v2273_v62  ;;  %v2279_v11 = vmax.f32 %v2271_v22, %v2275_v32 }
 0x94f   : > { %v2284_v59 = vcombine.low %v2276_v44, %v2277_v4  ;;  %v2285_v38 = vcombine.low %v2278_v51, %v2279_v11 }
 0x951   : > { %2288 = vst [vmem:[%s197_s10] sm:$0xff] %v2284_v59  ;;  %2289 = vst [vmem:[%s197_s10 + $0x8] sm:$0xff] %v2285_v38 }
 0x952 PF: > { %s14_s15 = sadd.s32 1, %s2610_s15  }
 0x953   : > { %p11_p4 = scmp.ge.s32.totalorder %s14_s15, 4  }
 0x955   :  { %13 = sbr.rel (!%p11_p4) target bundleno = 1 (0x1), region = 66 }

</bundles_post_ra>
